<compile_context>
chip_gen: v5e
topology: v5e:2x2
jax: 0.10.0
libtpu: 0.0.40
codegen_flags: <defaults>
</compile_context>

<pallas_src>
import jax
import jax.numpy as jnp
from jax.experimental import pallas as pl
from jax.experimental.pallas import tpu as pltpu

LANE = 128


def _round_up(n, m):
    return ((n + m - 1) // m) * m


def _make_kernel(n_mid: int):
    """Kernel factory; n_mid = number of residual hidden Linear layers."""

    def _body(x_ref, w0_ref, b0_ref, wmid_ref, bmid_ref, wlast_ref, blast_ref, o_ref):
        # Input projection (no activation): cast x to bf16 on the VPU (free here), MXU matmul
        # with f32 accumulation, bias add in f32.
        h = jnp.dot(x_ref[...].astype(jnp.bfloat16), w0_ref[...],
                    preferred_element_type=jnp.float32) + b0_ref[...]

        # Residual hidden blocks: h = h + relu(h @ Wi + bi). Elementwise math stays f32
        # (v5e-safe); only the MXU operand is downcast to bf16.
        def step(i, h):
            pre = jnp.dot(h.astype(jnp.bfloat16), wmid_ref[i],
                          preferred_element_type=jnp.float32) + bmid_ref[i]
            return h + jnp.maximum(pre, 0.0)

        if n_mid > 0:
            # Integer partial unroll: lets the scheduler overlap the next layer's wmid load /
            # bf16 cast under the current matmul without blowing vreg live ranges when deep.
            h = jax.lax.fori_loop(0, n_mid, step, h, unroll=min(n_mid, 4))

        # Output projection, no activation. Output block is (tb, T) (un-padded last dim).
        out = jnp.dot(h.astype(jnp.bfloat16), wlast_ref[...],
                      preferred_element_type=jnp.float32) + blast_ref[...]
        o_ref[...] = out.astype(o_ref.dtype)

    if n_mid > 0:
        return _body

    # num_layers == 3 edge case: no residual blocks -> no zero-sized wmid/bmid operands.
    def _body_no_mid(x_ref, w0_ref, b0_ref, wlast_ref, blast_ref, o_ref):
        return _body(x_ref, w0_ref, b0_ref, None, None, wlast_ref, blast_ref, o_ref)

    return _body_no_mid


def pack_params(params):
    """Zero-pad H up to a lane multiple (128) and cast weights to bf16 for the MXU.

    Padding is exact: padded hidden units get zero weight columns + zero bias so they stay 0
    through every residual block, and Wlast's padded rows are zero. The output (T) is NOT
    padded -- the kernel writes (tb, T) blocks directly.
    """
    F, H = params["w0"].shape
    T = params["wlast"].shape[1]
    n_mid = params["wmid"].shape[0]
    Hp = _round_up(H, LANE)

    packed = {
        "w0": jnp.pad(params["w0"], ((0, 0), (0, Hp - H))).astype(jnp.bfloat16),
        "b0": jnp.pad(params["b0"], ((0, 0), (0, Hp - H))).astype(jnp.float32),
        "wlast": jnp.pad(params["wlast"], ((0, Hp - H), (0, 0))).astype(jnp.bfloat16),
        "blast": params["blast"].astype(jnp.float32),
    }
    if n_mid > 0:
        packed["wmid"] = jnp.pad(
            params["wmid"], ((0, 0), (0, Hp - H), (0, Hp - H))).astype(jnp.bfloat16)
        packed["bmid"] = jnp.pad(
            params["bmid"], ((0, 0), (0, 0), (0, Hp - H))).astype(jnp.float32)

    meta = dict(F=F, H=H, Hp=Hp, T=T, n_mid=n_mid)
    return packed, meta


def _pick_tb(B):
    """Batch tile heuristic (always a multiple of 16)."""
    if B > 2048:
        return 1024                            # big tiles amortize ~0.35us/step grid overhead
    if B >= 32:
        return _round_up(pl.cdiv(B, 2), 16)    # exactly 2 steps -> v7x megacore can shard
    return _round_up(B, 16)                    # tiny batch: single step


def constant_width_ffnn(x, packed, meta, *, tb=None):
    """Fused forward pass. x: (B, F) float32; returns (B, T) float32."""
    B, F = x.shape
    assert F == meta["F"]
    Hp, T, n_mid = meta["Hp"], meta["T"], meta["n_mid"]

    tb = _pick_tb(B) if tb is None else _round_up(tb, 16)
    assert tb % 16 == 0, "batch tile must be a multiple of 16 (bf16 sublane packing)"
    Bp = _round_up(B, tb)
    xp = x if Bp == B else jnp.pad(x, ((0, Bp - B), (0, 0)))
    grid = (Bp // tb,)

    # Operand order must match the kernel signature.
    operands = [xp, packed["w0"], packed["b0"]]
    if n_mid > 0:
        operands += [packed["wmid"], packed["bmid"]]
    operands += [packed["wlast"], packed["blast"]]

    flops = 2 * Bp * (F * Hp + n_mid * Hp * Hp + Hp * T)
    bytes_accessed = int(sum(int(a.size) * a.dtype.itemsize for a in operands) + Bp * T * 4)

    # Explicit scoped-VMEM budget: pinned weights (x2 for safety if Buffered(1) is unavailable)
    # plus double-buffered x/out tiles, capped at 48 MiB for v7x's 64 MiB physical VMEM.
    pinned_bytes = int(sum(int(a.size) * a.dtype.itemsize for a in packed.values()))
    tile_bytes = 2 * (tb * F * 4 + tb * T * 4)
    vmem_limit = int(min(48 << 20, max(2 * pinned_bytes + tile_bytes + (4 << 20), 32 << 20)))

    def run(single_buffer_weights: bool):
        def pinned(a):
            # Whole-array block, constant index_map: DMA'd once, VMEM-resident across all
            # batch tiles. Buffered(1): weights never change, so no second buffer needed.
            nd = a.ndim
            idx = lambda i, _n=nd: (0,) * _n
            if single_buffer_weights:
                return pl.BlockSpec(a.shape, idx, pipeline_mode=pl.Buffered(1))
            return pl.BlockSpec(a.shape, idx)

        in_specs = [pl.BlockSpec((tb, F), lambda i: (i, 0)),
                    pinned(packed["w0"]), pinned(packed["b0"])]
        if n_mid > 0:
            in_specs += [pinned(packed["wmid"]), pinned(packed["bmid"])]
        in_specs += [pinned(packed["wlast"]), pinned(packed["blast"])]

        return pl.pallas_call(
            _make_kernel(n_mid),
            out_shape=jax.ShapeDtypeStruct((Bp, T), jnp.float32),
            grid=grid,
            in_specs=in_specs,
            # Un-padded output block: T equals the full last dim, so (tb, T) is legal and the
            # kernel writes only the real columns (no 16x padded writeback, no wrapper slice).
            out_specs=pl.BlockSpec((tb, T), lambda i: (i, 0)),
            compiler_params=pltpu.CompilerParams(
                dimension_semantics=("parallel",),     # megacore-shardable batch axis on v7x
                vmem_limit_bytes=vmem_limit),
            cost_estimate=pl.CostEstimate(flops=int(flops), transcendentals=0,
                                          bytes_accessed=bytes_accessed),
        )(*operands)

    try:
        out = run(True)
    except Exception:
        # Fallback for jax versions where pipeline_mode=pl.Buffered(1) is unsupported.
        out = run(False)

    return out if Bp == B else out[:B]


def reference_forward(x, params):
    """Pure-JAX f32 reference matching the PyTorch ConstantWidthFFNN.forward."""
    h = x @ params["w0"] + params["b0"]
    for i in range(params["wmid"].shape[0]):
        h = h + jax.nn.relu(h @ params["wmid"][i] + params["bmid"][i])
    return h @ params["wlast"] + params["blast"]


def init_params(key, feature_size, hidden_size, targets_size, num_layers):
    # Matches module construction: number of residual hidden Linears = num_layers - 3.
    n_mid = max(num_layers - 3, 0)
    keys = jax.random.split(key, 6)
    scale = 0.1
    return {
        "w0": scale * jax.random.normal(keys[0], (feature_size, hidden_size), jnp.float32),
        "b0": scale * jax.random.normal(keys[1], (1, hidden_size), jnp.float32),
        "wmid": scale * jax.random.normal(keys[2], (n_mid, hidden_size, hidden_size), jnp.float32),
        "bmid": scale * jax.random.normal(keys[3], (n_mid, 1, hidden_size), jnp.float32),
        "wlast": scale * jax.random.normal(keys[4], (hidden_size, targets_size), jnp.float32),
        "blast": scale * jax.random.normal(keys[5], (1, targets_size), jnp.float32),
    }


if __name__ == "__main__":
    # Module config: shape={"features": (16,), "targets": (8,)}, hidden_size=32, num_layers=5
    # -> Linear(16,32), 2 residual Linear(32,32) blocks, Linear(32,8).
    B, F, H, T = 512, 16, 32, 8     # B=512 -> tb=256, 2 grid steps (exercises batch tiling)
    NUM_LAYERS = 5

    key = jax.random.PRNGKey(0)
    kx, kp = jax.random.split(key)
    x = jax.random.normal(kx, (B, F), jnp.float32)
    params = init_params(kp, F, H, T, NUM_LAYERS)

    packed, meta = pack_params(params)
    out = jax.block_until_ready(constant_width_ffnn(x, packed, meta))

    ref = reference_forward(x, params)
    assert out.shape == (B, T)
    # bf16 MXU operands (with f32 accumulation) -> small, expected drift vs the pure-f32 reference.
    # Re-validate tolerance if n_mid grows large (bf16 re-quantization of h compounds per layer).
    assert jnp.allclose(out, ref, atol=5e-2, rtol=5e-2), "mismatch vs reference"
    print("KERNEL_OK")
</pallas_src>

<mosaic_0001>
module attributes {stable_mosaic.version = 11 : i64} {
  func.func @_body(%arg0: i32, %arg1: memref<256x16xf32, #tpu.memory_space<vmem>>, %arg2: memref<16x128xbf16, #tpu.memory_space<vmem>>, %arg3: memref<1x128xf32, #tpu.memory_space<vmem>>, %arg4: memref<2x128x128xbf16, #tpu.memory_space<vmem>>, %arg5: memref<2x1x128xf32, #tpu.memory_space<vmem>>, %arg6: memref<128x8xbf16, #tpu.memory_space<vmem>>, %arg7: memref<1x8xf32, #tpu.memory_space<vmem>>, %arg8: memref<256x8xf32, #tpu.memory_space<vmem>>) attributes {dimension_semantics = [#tpu.dimension_semantics<parallel>], iteration_bounds = array<i64: 2>, scalar_prefetch = 0 : i64, scratch_operands = 0 : i64, tpu.core_type = #tpu.core_type<tc>, window_params = [{transform_indices = @transform_0, window_bounds = array<i64: 256, 16>}, {pipeline_mode = #tpu.pipeline_mode<synchronous>, transform_indices = @transform_1, window_bounds = array<i64: 16, 128>}, {pipeline_mode = #tpu.pipeline_mode<synchronous>, transform_indices = @transform_2, window_bounds = array<i64: 1, 128>}, {pipeline_mode = #tpu.pipeline_mode<synchronous>, transform_indices = @transform_3, window_bounds = array<i64: 2, 128, 128>}, {pipeline_mode = #tpu.pipeline_mode<synchronous>, transform_indices = @transform_4, window_bounds = array<i64: 2, 1, 128>}, {pipeline_mode = #tpu.pipeline_mode<synchronous>, transform_indices = @transform_5, window_bounds = array<i64: 128, 8>}, {pipeline_mode = #tpu.pipeline_mode<synchronous>, transform_indices = @transform_6, window_bounds = array<i64: 1, 8>}, {transform_indices = @transform_7, window_bounds = array<i64: 256, 8>}]} {
    %c0 = arith.constant 0 : index
    %c0_0 = arith.constant 0 : index
    %0 = vector.load %arg1[%c0, %c0_0] : memref<256x16xf32, #tpu.memory_space<vmem>>, vector<256x16xf32>
    %1 = arith.truncf %0 : vector<256x16xf32> to vector<256x16xbf16>
    %c0_1 = arith.constant 0 : index
    %c0_2 = arith.constant 0 : index
    %2 = vector.load %arg2[%c0_1, %c0_2] : memref<16x128xbf16, #tpu.memory_space<vmem>>, vector<16x128xbf16>
    %cst = arith.constant dense<0.000000e+00> : vector<256x128xf32>
    %3 = tpu.matmul %1, %2, %cst {dimension_numbers = #tpu.dot_dimension_numbers<[1], [0], [0], [1], [0, 0, 1, 1], [], []>} : vector<256x16xbf16>, vector<16x128xbf16>, vector<256x128xf32> -> vector<256x128xf32>
    %c0_3 = arith.constant 0 : index
    %c0_4 = arith.constant 0 : index
    %4 = vector.load %arg3[%c0_3, %c0_4] : memref<1x128xf32, #tpu.memory_space<vmem>>, vector<1x128xf32>
    %5 = vector.broadcast %4 : vector<1x128xf32> to vector<256x128xf32>
    %6 = arith.addf %3, %5 : vector<256x128xf32>
    %c0_i32 = arith.constant 0 : i32
    %7 = arith.truncf %6 : vector<256x128xf32> to vector<256x128xbf16>
    %8 = arith.index_cast %c0_i32 : i32 to index
    %c0_5 = arith.constant 0 : index
    %c0_6 = arith.constant 0 : index
    %9 = vector.load %arg4[%8, %c0_5, %c0_6] : memref<2x128x128xbf16, #tpu.memory_space<vmem>>, vector<1x128x128xbf16>
    %10 = vector.shape_cast %9 : vector<1x128x128xbf16> to vector<128x128xbf16>
    %cst_7 = arith.constant dense<0.000000e+00> : vector<256x128xf32>
    %11 = tpu.matmul %7, %10, %cst_7 {dimension_numbers = #tpu.dot_dimension_numbers<[1], [0], [0], [1], [0, 0, 1, 1], [], []>} : vector<256x128xbf16>, vector<128x128xbf16>, vector<256x128xf32> -> vector<256x128xf32>
    %12 = arith.index_cast %c0_i32 : i32 to index
    %c0_8 = arith.constant 0 : index
    %c0_9 = arith.constant 0 : index
    %13 = vector.load %arg5[%12, %c0_8, %c0_9] : memref<2x1x128xf32, #tpu.memory_space<vmem>>, vector<1x1x128xf32>
    %14 = vector.shape_cast %13 : vector<1x1x128xf32> to vector<1x128xf32>
    %15 = vector.broadcast %14 : vector<1x128xf32> to vector<256x128xf32>
    %16 = arith.addf %11, %15 : vector<256x128xf32>
    %cst_10 = arith.constant 0.000000e+00 : f32
    %17 = vector.broadcast %cst_10 : f32 to vector<256x128xf32>
    %18 = arith.maximumf %16, %17 : vector<256x128xf32>
    %19 = arith.addf %6, %18 : vector<256x128xf32>
    %c1_i32 = arith.constant 1 : i32
    %20 = arith.truncf %19 : vector<256x128xf32> to vector<256x128xbf16>
    %21 = arith.index_cast %c1_i32 : i32 to index
    %c0_11 = arith.constant 0 : index
    %c0_12 = arith.constant 0 : index
    %22 = vector.load %arg4[%21, %c0_11, %c0_12] : memref<2x128x128xbf16, #tpu.memory_space<vmem>>, vector<1x128x128xbf16>
    %23 = vector.shape_cast %22 : vector<1x128x128xbf16> to vector<128x128xbf16>
    %cst_13 = arith.constant dense<0.000000e+00> : vector<256x128xf32>
    %24 = tpu.matmul %20, %23, %cst_13 {dimension_numbers = #tpu.dot_dimension_numbers<[1], [0], [0], [1], [0, 0, 1, 1], [], []>} : vector<256x128xbf16>, vector<128x128xbf16>, vector<256x128xf32> -> vector<256x128xf32>
    %25 = arith.index_cast %c1_i32 : i32 to index
    %c0_14 = arith.constant 0 : index
    %c0_15 = arith.constant 0 : index
    %26 = vector.load %arg5[%25, %c0_14, %c0_15] : memref<2x1x128xf32, #tpu.memory_space<vmem>>, vector<1x1x128xf32>
    %27 = vector.shape_cast %26 : vector<1x1x128xf32> to vector<1x128xf32>
    %28 = vector.broadcast %27 : vector<1x128xf32> to vector<256x128xf32>
    %29 = arith.addf %24, %28 : vector<256x128xf32>
    %cst_16 = arith.constant 0.000000e+00 : f32
    %30 = vector.broadcast %cst_16 : f32 to vector<256x128xf32>
    %31 = arith.maximumf %29, %30 : vector<256x128xf32>
    %32 = arith.addf %19, %31 : vector<256x128xf32>
    %c2_i32 = arith.constant 2 : i32
    %33 = arith.truncf %32 : vector<256x128xf32> to vector<256x128xbf16>
    %c0_17 = arith.constant 0 : index
    %c0_18 = arith.constant 0 : index
    %34 = vector.load %arg6[%c0_17, %c0_18] : memref<128x8xbf16, #tpu.memory_space<vmem>>, vector<128x8xbf16>
    %cst_19 = arith.constant dense<0.000000e+00> : vector<256x8xf32>
    %35 = tpu.matmul %33, %34, %cst_19 {dimension_numbers = #tpu.dot_dimension_numbers<[1], [0], [0], [1], [0, 0, 1, 1], [], []>} : vector<256x128xbf16>, vector<128x8xbf16>, vector<256x8xf32> -> vector<256x8xf32>
    %c0_20 = arith.constant 0 : index
    %c0_21 = arith.constant 0 : index
    %36 = vector.load %arg7[%c0_20, %c0_21] : memref<1x8xf32, #tpu.memory_space<vmem>>, vector<1x8xf32>
    %37 = vector.broadcast %36 : vector<1x8xf32> to vector<256x8xf32>
    %38 = arith.addf %35, %37 : vector<256x8xf32>
    %c0_22 = arith.constant 0 : index
    %c0_23 = arith.constant 0 : index
    %39 = vector.load %arg8[%c0_22, %c0_23] : memref<256x8xf32, #tpu.memory_space<vmem>>, vector<256x8xf32>
    tpu.vector_store %arg8[%c0_22, %c0_23], %38 {strides = array<i32>} : memref<256x8xf32, #tpu.memory_space<vmem>>, vector<256x8xf32>,
    return
  }
  func.func @transform_0(%arg0: i32) -> (i32, i32) {
    %c0_i32 = arith.constant 0 : i32
    %c0_i32_0 = arith.constant 0 : i32
    return %arg0, %c0_i32 : i32, i32
  }
  func.func @transform_1(%arg0: i32) -> (i32, i32) {
    %c0_i32 = arith.constant 0 : i32
    %c0_i32_0 = arith.constant 0 : i32
    %c0_i32_1 = arith.constant 0 : i32
    return %c0_i32, %c0_i32_0 : i32, i32
  }
  func.func @transform_2(%arg0: i32) -> (i32, i32) {
    %c0_i32 = arith.constant 0 : i32
    %c0_i32_0 = arith.constant 0 : i32
    %c0_i32_1 = arith.constant 0 : i32
    return %c0_i32, %c0_i32_0 : i32, i32
  }
  func.func @transform_3(%arg0: i32) -> (i32, i32, i32) {
    %c0_i32 = arith.constant 0 : i32
    %c0_i32_0 = arith.constant 0 : i32
    %c0_i32_1 = arith.constant 0 : i32
    %c0_i32_2 = arith.constant 0 : i32
    return %c0_i32, %c0_i32_0, %c0_i32_1 : i32, i32, i32
  }
  func.func @transform_4(%arg0: i32) -> (i32, i32, i32) {
    %c0_i32 = arith.constant 0 : i32
    %c0_i32_0 = arith.constant 0 : i32
    %c0_i32_1 = arith.constant 0 : i32
    %c0_i32_2 = arith.constant 0 : i32
    return %c0_i32, %c0_i32_0, %c0_i32_1 : i32, i32, i32
  }
  func.func @transform_5(%arg0: i32) -> (i32, i32) {
    %c0_i32 = arith.constant 0 : i32
    %c0_i32_0 = arith.constant 0 : i32
    %c0_i32_1 = arith.constant 0 : i32
    return %c0_i32, %c0_i32_0 : i32, i32
  }
  func.func @transform_6(%arg0: i32) -> (i32, i32) {
    %c0_i32 = arith.constant 0 : i32
    %c0_i32_0 = arith.constant 0 : i32
    %c0_i32_1 = arith.constant 0 : i32
    return %c0_i32, %c0_i32_0 : i32, i32
  }
  func.func @transform_7(%arg0: i32) -> (i32, i32) {
    %c0_i32 = arith.constant 0 : i32
    %c0_i32_0 = arith.constant 0 : i32
    return %arg0, %c0_i32 : i32, i32
  }
}

module attributes {stable_mosaic.version = 11 : i64} {
  func.func @_body(%arg0: i32, %arg1: memref<256x16xf32, #tpu.memory_space<vmem>>, %arg2: memref<16x128xbf16, #tpu.memory_space<vmem>>, %arg3: memref<1x128xf32, #tpu.memory_space<vmem>>, %arg4: memref<2x128x128xbf16, #tpu.memory_space<vmem>>, %arg5: memref<2x1x128xf32, #tpu.memory_space<vmem>>, %arg6: memref<128x8xbf16, #tpu.memory_space<vmem>>, %arg7: memref<1x8xf32, #tpu.memory_space<vmem>>, %arg8: memref<256x8xf32, #tpu.memory_space<vmem>>) attributes {dimension_semantics = [#tpu.dimension_semantics<parallel>], iteration_bounds = array<i64: 2>, scalar_prefetch = 0 : i64, scratch_operands = 0 : i64, tpu.core_type = #tpu.core_type<tc>, window_params = [{transform_indices = @transform_0, window_bounds = array<i64: 256, 16>}, {pipeline_mode = #tpu.pipeline_mode<synchronous>, transform_indices = @transform_1, window_bounds = array<i64: 16, 128>}, {pipeline_mode = #tpu.pipeline_mode<synchronous>, transform_indices = @transform_2, window_bounds = array<i64: 1, 128>}, {pipeline_mode = #tpu.pipeline_mode<synchronous>, transform_indices = @transform_3, window_bounds = array<i64: 2, 128, 128>}, {pipeline_mode = #tpu.pipeline_mode<synchronous>, transform_indices = @transform_4, window_bounds = array<i64: 2, 1, 128>}, {pipeline_mode = #tpu.pipeline_mode<synchronous>, transform_indices = @transform_5, window_bounds = array<i64: 128, 8>}, {pipeline_mode = #tpu.pipeline_mode<synchronous>, transform_indices = @transform_6, window_bounds = array<i64: 1, 8>}, {transform_indices = @transform_7, window_bounds = array<i64: 256, 8>}]} {
    %c0 = arith.constant 0 : index
    %c0_0 = arith.constant 0 : index
    %0 = vector.load %arg1[%c0, %c0_0] : memref<256x16xf32, #tpu.memory_space<vmem>>, vector<256x16xf32>
    %1 = arith.truncf %0 : vector<256x16xf32> to vector<256x16xbf16>
    %c0_1 = arith.constant 0 : index
    %c0_2 = arith.constant 0 : index
    %2 = vector.load %arg2[%c0_1, %c0_2] : memref<16x128xbf16, #tpu.memory_space<vmem>>, vector<16x128xbf16>
    %cst = arith.constant dense<0.000000e+00> : vector<256x128xf32>
    %3 = tpu.matmul %1, %2, %cst {dimension_numbers = #tpu.dot_dimension_numbers<[1], [0], [0], [1], [0, 0, 1, 1], [], []>} : vector<256x16xbf16>, vector<16x128xbf16>, vector<256x128xf32> -> vector<256x128xf32>
    %c0_3 = arith.constant 0 : index
    %c0_4 = arith.constant 0 : index
    %4 = vector.load %arg3[%c0_3, %c0_4] : memref<1x128xf32, #tpu.memory_space<vmem>>, vector<1x128xf32>
    %5 = vector.broadcast %4 : vector<1x128xf32> to vector<256x128xf32>
    %6 = arith.addf %3, %5 : vector<256x128xf32>
    %c0_i32 = arith.constant 0 : i32
    %7 = arith.truncf %6 : vector<256x128xf32> to vector<256x128xbf16>
    %8 = arith.index_cast %c0_i32 : i32 to index
    %c0_5 = arith.constant 0 : index
    %c0_6 = arith.constant 0 : index
    %9 = vector.load %arg4[%8, %c0_5, %c0_6] : memref<2x128x128xbf16, #tpu.memory_space<vmem>>, vector<1x128x128xbf16>
    %10 = vector.shape_cast %9 : vector<1x128x128xbf16> to vector<128x128xbf16>
    %cst_7 = arith.constant dense<0.000000e+00> : vector<256x128xf32>
    %11 = tpu.matmul %7, %10, %cst_7 {dimension_numbers = #tpu.dot_dimension_numbers<[1], [0], [0], [1], [0, 0, 1, 1], [], []>} : vector<256x128xbf16>, vector<128x128xbf16>, vector<256x128xf32> -> vector<256x128xf32>
    %12 = arith.index_cast %c0_i32 : i32 to index
    %c0_8 = arith.constant 0 : index
    %c0_9 = arith.constant 0 : index
    %13 = vector.load %arg5[%12, %c0_8, %c0_9] : memref<2x1x128xf32, #tpu.memory_space<vmem>>, vector<1x1x128xf32>
    %14 = vector.shape_cast %13 : vector<1x1x128xf32> to vector<1x128xf32>
    %15 = vector.broadcast %14 : vector<1x128xf32> to vector<256x128xf32>
    %16 = arith.addf %11, %15 : vector<256x128xf32>
    %cst_10 = arith.constant 0.000000e+00 : f32
    %17 = vector.broadcast %cst_10 : f32 to vector<256x128xf32>
    %18 = arith.maximumf %16, %17 : vector<256x128xf32>
    %19 = arith.addf %6, %18 : vector<256x128xf32>
    %c1_i32 = arith.constant 1 : i32
    %20 = arith.truncf %19 : vector<256x128xf32> to vector<256x128xbf16>
    %21 = arith.index_cast %c1_i32 : i32 to index
    %c0_11 = arith.constant 0 : index
    %c0_12 = arith.constant 0 : index
    %22 = vector.load %arg4[%21, %c0_11, %c0_12] : memref<2x128x128xbf16, #tpu.memory_space<vmem>>, vector<1x128x128xbf16>
    %23 = vector.shape_cast %22 : vector<1x128x128xbf16> to vector<128x128xbf16>
    %cst_13 = arith.constant dense<0.000000e+00> : vector<256x128xf32>
    %24 = tpu.matmul %20, %23, %cst_13 {dimension_numbers = #tpu.dot_dimension_numbers<[1], [0], [0], [1], [0, 0, 1, 1], [], []>} : vector<256x128xbf16>, vector<128x128xbf16>, vector<256x128xf32> -> vector<256x128xf32>
    %25 = arith.index_cast %c1_i32 : i32 to index
    %c0_14 = arith.constant 0 : index
    %c0_15 = arith.constant 0 : index
    %26 = vector.load %arg5[%25, %c0_14, %c0_15] : memref<2x1x128xf32, #tpu.memory_space<vmem>>, vector<1x1x128xf32>
    %27 = vector.shape_cast %26 : vector<1x1x128xf32> to vector<1x128xf32>
    %28 = vector.broadcast %27 : vector<1x128xf32> to vector<256x128xf32>
    %29 = arith.addf %24, %28 : vector<256x128xf32>
    %cst_16 = arith.constant 0.000000e+00 : f32
    %30 = vector.broadcast %cst_16 : f32 to vector<256x128xf32>
    %31 = arith.maximumf %29, %30 : vector<256x128xf32>
    %32 = arith.addf %19, %31 : vector<256x128xf32>
    %c2_i32 = arith.constant 2 : i32
    %33 = arith.truncf %32 : vector<256x128xf32> to vector<256x128xbf16>
    %c0_17 = arith.constant 0 : index
    %c0_18 = arith.constant 0 : index
    %34 = vector.load %arg6[%c0_17, %c0_18] : memref<128x8xbf16, #tpu.memory_space<vmem>>, vector<128x8xbf16>
    %cst_19 = arith.constant dense<0.000000e+00> : vector<256x8xf32>
    %35 = tpu.matmul %33, %34, %cst_19 {dimension_numbers = #tpu.dot_dimension_numbers<[1], [0], [0], [1], [0, 0, 1, 1], [], []>} : vector<256x128xbf16>, vector<128x8xbf16>, vector<256x8xf32> -> vector<256x8xf32>
    %c0_20 = arith.constant 0 : index
    %c0_21 = arith.constant 0 : index
    %36 = vector.load %arg7[%c0_20, %c0_21] : memref<1x8xf32, #tpu.memory_space<vmem>>, vector<1x8xf32>
    %37 = vector.broadcast %36 : vector<1x8xf32> to vector<256x8xf32>
    %38 = arith.addf %35, %37 : vector<256x8xf32>
    %c0_22 = arith.constant 0 : index
    %c0_23 = arith.constant 0 : index
    %39 = vector.load %arg8[%c0_22, %c0_23] : memref<256x8xf32, #tpu.memory_space<vmem>>, vector<256x8xf32>
    tpu.vector_store %arg8[%c0_22, %c0_23], %38 {strides = array<i32>} : memref<256x8xf32, #tpu.memory_space<vmem>>, vector<256x8xf32>,
    return
  }
  func.func @transform_0(%arg0: i32) -> (i32, i32) {
    %c0_i32 = arith.constant 0 : i32
    %c0_i32_0 = arith.constant 0 : i32
    return %arg0, %c0_i32 : i32, i32
  }
  func.func @transform_1(%arg0: i32) -> (i32, i32) {
    %c0_i32 = arith.constant 0 : i32
    %c0_i32_0 = arith.constant 0 : i32
    %c0_i32_1 = arith.constant 0 : i32
    return %c0_i32, %c0_i32_0 : i32, i32
  }
  func.func @transform_2(%arg0: i32) -> (i32, i32) {
    %c0_i32 = arith.constant 0 : i32
    %c0_i32_0 = arith.constant 0 : i32
    %c0_i32_1 = arith.constant 0 : i32
    return %c0_i32, %c0_i32_0 : i32, i32
  }
  func.func @transform_3(%arg0: i32) -> (i32, i32, i32) {
    %c0_i32 = arith.constant 0 : i32
    %c0_i32_0 = arith.constant 0 : i32
    %c0_i32_1 = arith.constant 0 : i32
    %c0_i32_2 = arith.constant 0 : i32
    return %c0_i32, %c0_i32_0, %c0_i32_1 : i32, i32, i32
  }
  func.func @transform_4(%arg0: i32) -> (i32, i32, i32) {
    %c0_i32 = arith.constant 0 : i32
    %c0_i32_0 = arith.constant 0 : i32
    %c0_i32_1 = arith.constant 0 : i32
    %c0_i32_2 = arith.constant 0 : i32
    return %c0_i32, %c0_i32_0, %c0_i32_1 : i32, i32, i32
  }
  func.func @transform_5(%arg0: i32) -> (i32, i32) {
    %c0_i32 = arith.constant 0 : i32
    %c0_i32_0 = arith.constant 0 : i32
    %c0_i32_1 = arith.constant 0 : i32
    return %c0_i32, %c0_i32_0 : i32, i32
  }
  func.func @transform_6(%arg0: i32) -> (i32, i32) {
    %c0_i32 = arith.constant 0 : i32
    %c0_i32_0 = arith.constant 0 : i32
    %c0_i32_1 = arith.constant 0 : i32
    return %c0_i32, %c0_i32_0 : i32, i32
  }
  func.func @transform_7(%arg0: i32) -> (i32, i32) {
    %c0_i32 = arith.constant 0 : i32
    %c0_i32_0 = arith.constant 0 : i32
    return %arg0, %c0_i32 : i32, i32
  }
}

</mosaic_0001>

<bundles_post_ra>
// kernel: tpu_custom_call.1
= control target key start
LH: loop header
LB: loop body
LE: loop exit
PB: predicated region body
PF: predicated region fallthrough
CT: control target
= control target key end

     0   :  { %s1448_s24 = smov 0   ;;  %s2067_s0 = inlined_call_operand.vmem [shape: f32[512,16], index: 0, kind: input, shape index: {}]   ;;  %s2068_s1 = inlined_call_operand.vmem [shape: bf16[16,128], index: 1, kind: input, shape index: {}]   ;;  %s2069_s2 = inlined_call_operand.vmem [shape: f32[1,128], index: 2, kind: input, shape index: {}]   ;;  %s2070_s3 = inlined_call_operand.vmem [shape: bf16[2,128,128], index: 3, kind: input, shape index: {}]   ;;  %s2071_s4 = inlined_call_operand.vmem [shape: f32[2,1,128], index: 4, kind: input, shape index: {}]   ;;  %s2072_s5 = inlined_call_operand.vmem [shape: bf16[128,8], index: 5, kind: input, shape index: {}]   ;;  %s2073_s6 = inlined_call_operand.vmem [shape: f32[1,8], index: 6, kind: input, shape index: {}]   ;;  %s2074_s7 = inlined_call_operand.vmem [shape: f32[512,8], index: 7, kind: output, shape index: {}]  }
   0x1 LB: > { %s1219_s25 = sadd.s32 4294967295, %s1406_s24   ;;  %p1223_p0 = scmp.ge.s32.totalorder %s1406_s24, 1  ;;  %s1406_s24 = sphi %s1448_s24, %s17_s24  }
   0x2   : > { %p238_p1 = scmp.lt.s32.totalorder %s1406_s24, 3 }
   0x4   : > { %p239_p2 = pnand %p1223_p0, %p238_p1 }
   0x5   : > { %s1224_s28 = sshll.u32 (!%p239_p2), %s1219_s25, 5 }
   0x6   : > { %242 = sbr.rel (%p239_p2) target bundleno = 828 (0x33c), region = 48  ;;  %p271_p3 = scmp.lt.s32.totalorder (!%p239_p2), %s1224_s28, 63 }
   0xb   : > { %v1363_v0 = vld [vmem:[%s2068_s1] sm:$0xff]  ;;  %s2076_s28 = smov (!%p271_p3, %s1224_s28), 63  ;;  %vm343_vm0 = vcmask 130048   ;;  %v1371_v16 = vld [vmem:[%s2070_s3 + $0x38] sm:$0xff]  ;;  %v1370_v17 = vld [vmem:[%s2070_s3 + $0x30] sm:$0xff]  ;;  %vm1130_vm1 = vcmask 64512  }
   0xc   : > { %399 = vmatpush.bf16.msra.mxu0 %v1363_v0  ;;  %s1225_s29 = sshll.u32 %s2076_s28, 3  ;;  %565 = vmatpush.bf16.msra.mxu1 %v1371_v16  ;;  %v1369_v21 = vld [vmem:[%s2070_s3 + $0x28] sm:$0xff]  ;;  %v1368_v22 = vld [vmem:[%s2070_s3 + $0x20] sm:$0xff]  ;;  %v1367_v23 = vld [vmem:[%s2070_s3 + $0x18] sm:$0xff] }
   0xd   : > { %s1467_s9 = scalar_lea.vmem %s2067_s0, %s1225_s29  ;;  %v1366_v27 = vld [vmem:[%s2070_s3 + $0x10] sm:$0xff]  ;;  %v1365_v28 = vld [vmem:[%s2070_s3 + $0x8] sm:$0xff]  ;;  %v1364_v29 = vld [vmem:[%s2070_s3] sm:$0xff]  ;;  %s1938_s8 = scalar_lea.vmem %s2074_s7, %s1225_s29 }
   0xe   : > { %v283_v1 = vld [vmem:[%s1467_s9] sm:$0xff]  ;;  %v284_v2 = vld [vmem:[%s1467_s9 + $0x8] sm:$0xff]  ;;  %v285_v4 = vld [vmem:[%s1467_s9 + $0x10] sm:$0xff] }
   0xf   : > { %v315_v3 = vpack.c.bf16 %v284_v2, %v283_v1  ;;  %v286_v5 = vld [vmem:[%s1467_s9 + $0x18] sm:$0xff]  ;;  %v287_v7 = vld [vmem:[%s1467_s9 + $0x20] sm:$0xff]  ;;  %v288_v8 = vld [vmem:[%s1467_s9 + $0x28] sm:$0xff] }
  0x10   : > { %v316_v6 = vpack.c.bf16 %v286_v5, %v285_v4  ;;  %v317_v9 = vpack.c.bf16 %v288_v8, %v287_v7  ;;  %v289_v10 = vld [vmem:[%s1467_s9 + $0x30] sm:$0xff]  ;;  %v290_v11 = vld [vmem:[%s1467_s9 + $0x38] sm:$0xff]  ;;  %v291_v13 = vld [vmem:[%s1467_s9 + $0x40] sm:$0xff]  ;;  %566 = vmatpush.bf16.msra.mxu1 %v1370_v17 }
  0x11   : > { %1232 = vmatmul.msk.bf16.vlgmr.msra.gmra.mxu0 %vm343_vm0, %v315_v3  ;;  %v318_v12 = vpack.c.bf16 %v290_v11, %v289_v10  ;;  %v292_v14 = vld [vmem:[%s1467_s9 + $0x48] sm:$0xff]  ;;  %v293_v18 = vld [vmem:[%s1467_s9 + $0x50] sm:$0xff]  ;;  %v294_v19 = vld [vmem:[%s1467_s9 + $0x58] sm:$0xff] }
  0x12   : > { %v319_v15 = vpack.c.bf16 %v292_v14, %v291_v13  ;;  %v320_v20 = vpack.c.bf16 %v294_v19, %v293_v18  ;;  %v295_v24 = vld [vmem:[%s1467_s9 + $0x60] sm:$0xff]  ;;  %v296_v25 = vld [vmem:[%s1467_s9 + $0x68] sm:$0xff]  ;;  %v297_v30 = vld [vmem:[%s1467_s9 + $0x70] sm:$0xff] }
  0x13   : > { %v321_v26 = vpack.c.bf16 %v296_v25, %v295_v24  ;;  %v298_v31 = vld [vmem:[%s1467_s9 + $0x78] sm:$0xff]  ;;  %v299_v33 = vld [vmem:[%s1467_s9 + $0x80] sm:$0xff]  ;;  %v300_v34 = vld [vmem:[%s1467_s9 + $0x88] sm:$0xff] }
  0x14   : > { %567 = vmatpush.bf16.msra.mxu1 %v1369_v21  ;;  %v322_v32 = vpack.c.bf16 %v298_v31, %v297_v30  ;;  %v323_v35 = vpack.c.bf16 %v300_v34, %v299_v33  ;;  %v1523_v37 = vld [vmem:[%s2069_s2] ss:$0 sm:$0xff]  ;;  %v301_v42 = vld [vmem:[%s1467_s9 + $0x90] sm:$0xff]  ;;  %v302_v43 = vld [vmem:[%s1467_s9 + $0x98] sm:$0xff] }
  0x15   : > { %v324_v44 = vpack.c.bf16 %v302_v43, %v301_v42  ;;  %v303_v50 = vld [vmem:[%s1467_s9 + $0xa0] sm:$0xff]  ;;  %v304_v51 = vld [vmem:[%s1467_s9 + $0xa8] sm:$0xff]  ;;  %v305_v58 = vld [vmem:[%s1467_s9 + $0xb0] sm:$0xff] }
  0x16   : > { %v325_v52 = vpack.c.bf16 %v304_v51, %v303_v50  ;;  %v306_v59 = vld [vmem:[%s1467_s9 + $0xb8] sm:$0xff]  ;;  %v307_v2 = vld [vmem:[%s1467_s9 + $0xc0] sm:$0xff]  ;;  %v308_v3 = vld [vmem:[%s1467_s9 + $0xc8] sm:$0xff] }
  0x17   : > { %v326_v60 = vpack.c.bf16 %v306_v59, %v305_v58  ;;  %v327_v4 = vpack.c.bf16 %v308_v3, %v307_v2  ;;  %v309_v10 = vld [vmem:[%s1467_s9 + $0xd0] sm:$0xff]  ;;  %v310_v11 = vld [vmem:[%s1467_s9 + $0xd8] sm:$0xff]  ;;  %v311_v19 = vld [vmem:[%s1467_s9 + $0xe0] sm:$0xff] }
  0x18   : > { %568 = vmatpush.bf16.msra.mxu1 %v1368_v22  ;;  %v1379_v17 = vld [vmem:[%s2070_s3 + $0x78] sm:$0xff]  ;;  %v1378_v21 = vld [vmem:[%s2070_s3 + $0x70] sm:$0xff]  ;;  %v1377_v24 = vld [vmem:[%s2070_s3 + $0x68] sm:$0xff] }
  0x19   : > { %804 = vmatpush.bf16.msra.mxu2 %v1379_v17  ;;  %v1376_v25 = vld [vmem:[%s2070_s3 + $0x60] sm:$0xff]  ;;  %v313_v31 = vld [vmem:[%s1467_s9 + $0xf0] sm:$0xff] }
  0x1a   : > { %v1374_v33 = vld [vmem:[%s2070_s3 + $0x50] sm:$0xff] }
  0x1c   : > { %569 = vmatpush.bf16.msra.mxu1 %v1367_v23 }
  0x1d   : > { %805 = vmatpush.bf16.msra.mxu2 %v1378_v21 }
  0x20   : > { %570 = vmatpush.bf16.msra.mxu1 %v1366_v27 }
  0x21   : > { %1233 = vmatmul.msk.bf16.gmra.mxu0 %vm343_vm0, %v316_v6  ;;  %806 = vmatpush.bf16.msra.mxu2 %v1377_v24 }
  0x24   : > { %571 = vmatpush.bf16.msra.mxu1 %v1365_v28 }
  0x25   : > { %807 = vmatpush.bf16.msra.mxu2 %v1376_v25 }
  0x28   : > { %572 = vmatpush.bf16.msra.mxu1 %v1364_v29  ;;  %v1375_v29 = vld [vmem:[%s2070_s3 + $0x58] sm:$0xff] }
  0x29   : > { %808 = vmatpush.bf16.msra.mxu2 %v1375_v29 }
  0x2d   : > { %809 = vmatpush.bf16.msra.mxu2 %v1374_v33 }
  0x31   : > { %1234 = vmatmul.msk.bf16.gmra.mxu0 %vm343_vm0, %v317_v9 }
  0x41   : > { %1235 = vmatmul.msk.bf16.gmra.mxu0 %vm343_vm0, %v318_v12  ;;  %v328_v12 = vpack.c.bf16 %v310_v11, %v309_v10 }
  0x51   : > { %1236 = vmatmul.msk.bf16.gmra.mxu0 %vm343_vm0, %v319_v15 }
  0x61   : > { %1237 = vmatmul.msk.bf16.gmra.mxu0 %vm343_vm0, %v320_v20  ;;  %v312_v20 = vld [vmem:[%s1467_s9 + $0xe8] sm:$0xff] }
  0x62   : > { %v329_v22 = vpack.c.bf16 %v312_v20, %v311_v19 }
  0x71   : > { %1238 = vmatmul.msk.bf16.gmra.mxu0 %vm343_vm0, %v321_v26 }
  0x81   : > { %1239 = vmatmul.msk.bf16.gmra.mxu0 %vm343_vm0, %v322_v32  ;;  %v314_v32 = vld [vmem:[%s1467_s9 + $0xf8] sm:$0xff] }
  0x82   : > { %v330_v34 = vpack.c.bf16 %v314_v32, %v313_v31 }
  0x8e   : > { %v401_v36 = vpop.f32.mrf.mxu0 }
  0x8f   : > { %v1526_v39 = vadd.f32 %v1523_v37, %v401_v36  ;;  %v1373_v36 = vld [vmem:[%s2070_s3 + $0x48] sm:$0xff] }
  0x90   : > { %810 = vmatpush.bf16.msra.mxu2 %v1373_v36 }
  0x91   : > { %1240 = vmatmul.msk.bf16.gmra.mxu0 %vm343_vm0, %v323_v35 }
  0x96   : > { %v403_v38 = vpop.f32.mrf.mxu0 }
  0x97   : > { %v1529_v40 = vadd.f32 %v1523_v37, %v403_v38  ;;  %v1372_v38 = vld [vmem:[%s2070_s3 + $0x40] sm:$0xff] }
  0x98   : > { %811 = vmatpush.bf16.msra.mxu2 %v1372_v38 }
  0x99   : > { %v481_v41 = vpack.c.bf16 %v1529_v40, %v1526_v39 }
  0x9b   : > { %573 = vmatmul.bf16.vlgmr.msra.gmra.mxu1 %v481_v41 }
  0x9e   : > { %v406_v45 = vpop.f32.mrf.mxu0 }
  0x9f   : > { %v1537_v47 = vadd.f32 %v1523_v37, %v406_v45 }
  0xa1   : > { %1241 = vmatmul.msk.bf16.gmra.mxu0 %vm343_vm0, %v324_v44 }
  0xa6   : > { %v408_v46 = vpop.f32.mrf.mxu0 }
  0xa7   : > { %v1540_v48 = vadd.f32 %v1523_v37, %v408_v46 }
  0xa9   : > { %v482_v49 = vpack.c.bf16 %v1540_v48, %v1537_v47 }
  0xab   : > { %578 = vmatmul.bf16.gmra.mxu1 %v482_v49 }
  0xae   : > { %v411_v53 = vpop.f32.mrf.mxu0 }
  0xaf   : > { %v1548_v55 = vadd.f32 %v1523_v37, %v411_v53 }
  0xb1   : > { %1242 = vmatmul.msk.bf16.gmra.mxu0 %vm343_vm0, %v325_v52  ;;  %v1643_v52 = vld [vmem:[%s2071_s4] ss:$0 sm:$0xff] }
  0xb6   : > { %v413_v54 = vpop.f32.mrf.mxu0 }
  0xb7   : > { %v1551_v56 = vadd.f32 %v1523_v37, %v413_v54 }
  0xb9   : > { %v483_v57 = vpack.c.bf16 %v1551_v56, %v1548_v55 }
  0xbb   : > { %583 = vmatmul.bf16.gmra.mxu1 %v483_v57 }
  0xbe   : > { %v416_v61 = vpop.f32.mrf.mxu0 }
  0xbf   : > { %v1559_v63 = vadd.f32 %v1523_v37, %v416_v61 }
  0xc1   : > { %1243 = vmatmul.msk.bf16.gmra.mxu0 %vm343_vm0, %v326_v60 }
  0xc6   : > { %v418_v62 = vpop.f32.mrf.mxu0 }
  0xc7   : > { %v1562_v0 = vadd.f32 %v1523_v37, %v418_v62 }
  0xc9   : > { %v484_v1 = vpack.c.bf16 %v1562_v0, %v1559_v63 }
  0xcb   : > { %588 = vmatmul.bf16.gmra.mxu1 %v484_v1 }
  0xce   : > { %v421_v5 = vpop.f32.mrf.mxu0 }
  0xcf   : > { %v1570_v7 = vadd.f32 %v1523_v37, %v421_v5 }
  0xd1   : > { %1244 = vmatmul.msk.bf16.gmra.mxu0 %vm343_vm0, %v327_v4 }
  0xd6   : > { %v423_v6 = vpop.f32.mrf.mxu0 }
  0xd7   : > { %v1573_v8 = vadd.f32 %v1523_v37, %v423_v6 }
  0xd9   : > { %v485_v9 = vpack.c.bf16 %v1573_v8, %v1570_v7 }
  0xdb   : > { %593 = vmatmul.bf16.gmra.mxu1 %v485_v9 }
  0xde   : > { %v426_v13 = vpop.f32.mrf.mxu0 }
  0xdf   : > { %v1581_v15 = vadd.f32 %v1523_v37, %v426_v13 }
  0xe1   : > { %1245 = vmatmul.msk.bf16.gmra.mxu0 %vm343_vm0, %v328_v12 }
  0xe6   : > { %v428_v14 = vpop.f32.mrf.mxu0 }
  0xe7   : > { %v1584_v16 = vadd.f32 %v1523_v37, %v428_v14 }
  0xe9   : > { %v486_v18 = vpack.c.bf16 %v1584_v16, %v1581_v15 }
  0xeb   : > { %598 = vmatmul.bf16.gmra.mxu1 %v486_v18 }
  0xee   : > { %v431_v23 = vpop.f32.mrf.mxu0 }
  0xef   : > { %v1604_v27 = vadd.f32 %v1523_v37, %v431_v23 }
  0xf1   : > { %1246 = vmatmul.msk.bf16.gmra.mxu0 %vm343_vm0, %v329_v22 }
  0xf6   : > { %v433_v26 = vpop.f32.mrf.mxu0 }
  0xf7   : > { %v1607_v28 = vadd.f32 %v1523_v37, %v433_v26 }
  0xf9   : > { %v487_v30 = vpack.c.bf16 %v1607_v28, %v1604_v27 }
  0xfb   : > { %603 = vmatmul.bf16.gmra.mxu1 %v487_v30 }
  0xfe   : > { %v436_v35 = vpop.f32.mrf.mxu0 }
  0xff   : > { %v1627_v42 = vadd.f32 %v1523_v37, %v436_v35 }
 0x101   : > { %1247 = vmatmul.msk.bf16.gmra.mxu0 %vm343_vm0, %v330_v34 }
 0x106   : > { %v438_v41 = vpop.f32.mrf.mxu0 }
 0x107   : > { %v1630_v43 = vadd.f32 %v1523_v37, %v438_v41 }
 0x109   : > { %v488_v44 = vpack.c.bf16 %v1630_v43, %v1627_v42 }
 0x10b   : > { %608 = vmatmul.bf16.gmra.mxu1 %v488_v44 }
 0x10e   : > { %v441_v45 = vpop.f32.mrf.mxu0 }
 0x10f   : > { %v1635_v49 = vadd.f32 %v1523_v37, %v441_v45 }
 0x116   : > { %v443_v46 = vpop.f32.mrf.mxu0 }
 0x117   : > { %v1638_v50 = vadd.f32 %v1523_v37, %v443_v46 }
 0x118   : > { %v574_v51 = vpop.f32.mrf.mxu1 }
 0x119   : > { %v489_v53 = vpack.c.bf16 %v1638_v50, %v1635_v49  ;;  %v575_v54 = vadd.f32 %v1643_v52, %v574_v51 }
 0x11b   : > { %613 = vmatmul.bf16.gmra.mxu1 %v489_v53  ;;  %v654_v59 = vmax.f32 %v575_v54, 0.0 }
 0x11d   : > { %v1650_v62 = vadd.f32 %v654_v59, %v1526_v39 }
 0x11e   : > { %v446_v57 = vpop.f32.mrf.mxu0 }
 0x11f   : > { %v1656_v3 = vadd.f32 %v1523_v37, %v446_v57 }
 0x120   : > { %v576_v58 = vpop.f32.mrf.mxu1 }
 0x121   : > { %v577_v60 = vadd.f32 %v1643_v52, %v576_v58 }
 0x123   : > { %v655_v61 = vmax.f32 %v577_v60, 0.0 }
 0x125   : > { %v1653_v1 = vadd.f32 %v655_v61, %v1529_v40 }
 0x126   : > { %v448_v2 = vpop.f32.mrf.mxu0 }
 0x127   : > { %v1659_v4 = vadd.f32 %v1523_v37, %v448_v2  ;;  %v718_v5 = vpack.c.bf16 %v1653_v1, %v1650_v62 }
 0x128   : > { %v579_v6 = vpop.f32.mrf.mxu1 }
 0x129   : > { %812 = vmatmul.bf16.vlgmr.msra.gmra.mxu2 %v718_v5  ;;  %v490_v9 = vpack.c.bf16 %v1659_v4, %v1656_v3  ;;  %v580_v39 = vadd.f32 %v1643_v52, %v579_v6 }
 0x12b   : > { %618 = vmatmul.bf16.gmra.mxu1 %v490_v9  ;;  %v656_v11 = vmax.f32 %v580_v39, 0.0 }
 0x12d   : > { %v1668_v14 = vadd.f32 %v656_v11, %v1537_v47 }
 0x12e   : > { %v451_v40 = vpop.f32.mrf.mxu0 }
 0x12f   : > { %v1674_v19 = vadd.f32 %v1523_v37, %v451_v40 }
 0x130   : > { %v581_v10 = vpop.f32.mrf.mxu1 }
 0x131   : > { %v582_v12 = vadd.f32 %v1643_v52, %v581_v10 }
 0x133   : > { %v657_v13 = vmax.f32 %v582_v12, 0.0 }
 0x135   : > { %v1671_v17 = vadd.f32 %v657_v13, %v1540_v48 }
 0x136   : > { %v453_v18 = vpop.f32.mrf.mxu0 }
 0x137   : > { %v1677_v20 = vadd.f32 %v1523_v37, %v453_v18  ;;  %v719_v21 = vpack.c.bf16 %v1671_v17, %v1668_v14 }
 0x138   : > { %v584_v22 = vpop.f32.mrf.mxu1 }
 0x139   : > { %817 = vmatmul.bf16.gmra.mxu2 %v719_v21  ;;  %v491_v23 = vpack.c.bf16 %v1677_v20, %v1674_v19  ;;  %v585_v47 = vadd.f32 %v1643_v52, %v584_v22 }
 0x13b   : > { %623 = vmatmul.bf16.gmra.mxu1 %v491_v23  ;;  %v658_v25 = vmax.f32 %v585_v47, 0.0 }
 0x13d   : > { %v1686_v30 = vadd.f32 %v658_v25, %v1548_v55 }
 0x13e   : > { %v456_v48 = vpop.f32.mrf.mxu0 }
 0x13f   : > { %v1692_v33 = vadd.f32 %v1523_v37, %v456_v48 }
 0x140   : > { %v586_v24 = vpop.f32.mrf.mxu1 }
 0x141   : > { %v587_v26 = vadd.f32 %v1643_v52, %v586_v24 }
 0x143   : > { %v659_v29 = vmax.f32 %v587_v26, 0.0 }
 0x145   : > { %v1689_v31 = vadd.f32 %v659_v29, %v1551_v56 }
 0x146   : > { %v458_v32 = vpop.f32.mrf.mxu0 }
 0x147   : > { %v1695_v34 = vadd.f32 %v1523_v37, %v458_v32  ;;  %v720_v35 = vpack.c.bf16 %v1689_v31, %v1686_v30 }
 0x148   : > { %v589_v36 = vpop.f32.mrf.mxu1 }
 0x149   : > { %822 = vmatmul.bf16.gmra.mxu2 %v720_v35  ;;  %v492_v38 = vpack.c.bf16 %v1695_v34, %v1692_v33  ;;  %v590_v55 = vadd.f32 %v1643_v52, %v589_v36 }
 0x14b   : > { %628 = vmatmul.bf16.gmra.mxu1 %v492_v38  ;;  %v660_v44 = vmax.f32 %v590_v55, 0.0 }
 0x14d   : > { %v1704_v51 = vadd.f32 %v660_v44, %v1559_v63 }
 0x14e   : > { %v461_v56 = vpop.f32.mrf.mxu0 }
 0x14f   : > { %v1710_v57 = vadd.f32 %v1523_v37, %v461_v56 }
 0x150   : > { %v591_v41 = vpop.f32.mrf.mxu1 }
 0x151   : > { %v592_v45 = vadd.f32 %v1643_v52, %v591_v41  ;;  %v1386_v41 = vld [vmem:[%s2072_s5 + $0x30] sm:$0xff] }
 0x153   : > { %v661_v46 = vmax.f32 %v592_v45, 0.0 }
 0x155   : > { %v1707_v53 = vadd.f32 %v661_v46, %v1562_v0 }
 0x156   : > { %v463_v54 = vpop.f32.mrf.mxu0 }
 0x157   : > { %v1713_v58 = vadd.f32 %v1523_v37, %v463_v54  ;;  %v721_v59 = vpack.c.bf16 %v1707_v53, %v1704_v51  ;;  %v1385_v54 = vld [vmem:[%s2072_s5 + $0x28] sm:$0xff] }
 0x158   : > { %v594_v60 = vpop.f32.mrf.mxu1 }
 0x159   : > { %v493_v61 = vpack.c.bf16 %v1713_v58, %v1710_v57  ;;  %827 = vmatmul.bf16.gmra.mxu2 %v721_v59  ;;  %v595_v63 = vadd.f32 %v1643_v52, %v594_v60 }
 0x15b   : > { %633 = vmatmul.bf16.gmra.mxu1 %v493_v61  ;;  %v662_v5 = vmax.f32 %v595_v63, 0.0 }
 0x15d   : > { %v1722_v39 = vadd.f32 %v662_v5, %v1570_v7 }
 0x15e   : > { %v466_v0 = vpop.f32.mrf.mxu0 }
 0x15f   : > { %v1728_v11 = vadd.f32 %v1523_v37, %v466_v0 }
 0x160   : > { %v596_v2 = vpop.f32.mrf.mxu1 }
 0x161   : > { %v597_v6 = vadd.f32 %v1643_v52, %v596_v2 }
 0x163   : > { %v663_v9 = vmax.f32 %v597_v6, 0.0  ;;  %v1383_v6 = vld [vmem:[%s2072_s5 + $0x18] sm:$0xff] }
 0x165   : > { %v1725_v40 = vadd.f32 %v663_v9, %v1573_v8 }
 0x166   : > { %v468_v10 = vpop.f32.mrf.mxu0 }
 0x167   : > { %v1731_v12 = vadd.f32 %v1523_v37, %v468_v10  ;;  %v722_v13 = vpack.c.bf16 %v1725_v40, %v1722_v39  ;;  %v1382_v10 = vld [vmem:[%s2072_s5 + $0x10] sm:$0xff] }
 0x168   : > { %v599_v18 = vpop.f32.mrf.mxu1 }
 0x169   : > { %v494_v21 = vpack.c.bf16 %v1731_v12, %v1728_v11  ;;  %832 = vmatmul.bf16.gmra.mxu2 %v722_v13  ;;  %v600_v7 = vadd.f32 %v1643_v52, %v599_v18 }
 0x16b   : > { %638 = vmatmul.bf16.gmra.mxu1 %v494_v21  ;;  %v664_v23 = vmax.f32 %v600_v7, 0.0  ;;  %v1381_v7 = vld [vmem:[%s2072_s5 + $0x8] sm:$0xff] }
 0x16d   : > { %v1740_v24 = vadd.f32 %v664_v23, %v1581_v15  ;;  %v1387_v15 = vld [vmem:[%s2072_s5 + $0x38] sm:$0xff] }
 0x16e   : > { %v471_v8 = vpop.f32.mrf.mxu0  ;;  %1041 = vmatpush.bf16.msra.mxu3 %v1387_v15 }
 0x16f   : > { %v1746_v29 = vadd.f32 %v1523_v37, %v471_v8 }
 0x170   : > { %v601_v22 = vpop.f32.mrf.mxu1 }
 0x171   : > { %v602_v47 = vadd.f32 %v1643_v52, %v601_v22 }
 0x172   : > { %1042 = vmatpush.bf16.msra.mxu3 %v1386_v41 }
 0x173   : > { %v665_v48 = vmax.f32 %v602_v47, 0.0 }
 0x175   : > { %v1743_v25 = vadd.f32 %v665_v48, %v1584_v16  ;;  %v1380_v48 = vld [vmem:[%s2072_s5] sm:$0xff] }
 0x176   : > { %v473_v26 = vpop.f32.mrf.mxu0  ;;  %1043 = vmatpush.bf16.msra.mxu3 %v1385_v54 }
 0x177   : > { %v1749_v32 = vadd.f32 %v1523_v37, %v473_v26  ;;  %v723_v35 = vpack.c.bf16 %v1743_v25, %v1740_v24 }
 0x178   : > { %v604_v36 = vpop.f32.mrf.mxu1 }
 0x179   : > { %v495_v38 = vpack.c.bf16 %v1749_v32, %v1746_v29  ;;  %837 = vmatmul.bf16.gmra.mxu2 %v723_v35  ;;  %v605_v16 = vadd.f32 %v1643_v52, %v604_v36 }
 0x17b   : > { %643 = vmatmul.bf16.gmra.mxu1 %v495_v38  ;;  %v666_v44 = vmax.f32 %v605_v16, 0.0 }
 0x17d   : > { %v1767_v59 = vadd.f32 %v666_v44, %v1604_v27  ;;  %v1384_v27 = vld [vmem:[%s2072_s5 + $0x20] sm:$0xff] }
 0x17e   : > { %v476_v55 = vpop.f32.mrf.mxu0  ;;  %1044 = vmatpush.bf16.msra.mxu3 %v1384_v27  ;;  %v1821_v44 = vld [vmem:[%s2071_s4 + $0x1] ss:$0 sm:$0xff] }
 0x17f   : > { %v1773_v63 = vadd.f32 %v1523_v37, %v476_v55 }
 0x180   : > { %v606_v56 = vpop.f32.mrf.mxu1 }
 0x181   : > { %v607_v45 = vadd.f32 %v1643_v52, %v606_v56 }
 0x182   : > { %1045 = vmatpush.bf16.msra.mxu3 %v1383_v6 }
 0x183   : > { %v667_v46 = vmax.f32 %v607_v45, 0.0 }
 0x185   : > { %v1770_v60 = vadd.f32 %v667_v46, %v1607_v28 }
 0x186   : > { %v478_v61 = vpop.f32.mrf.mxu0  ;;  %1046 = vmatpush.bf16.msra.mxu3 %v1382_v10 }
 0x187   : > { %v1776_v0 = vadd.f32 %v1523_v37, %v478_v61  ;;  %v724_v2 = vpack.c.bf16 %v1770_v60, %v1767_v59 }
 0x188   : > { %v609_v5 = vpop.f32.mrf.mxu1 }
 0x189   : > { %v496_v28 = vpack.c.bf16 %v1776_v0, %v1773_v63  ;;  %842 = vmatmul.bf16.gmra.mxu2 %v724_v2  ;;  %v610_v37 = vadd.f32 %v1643_v52, %v609_v5 }
 0x18a   : > { %1047 = vmatpush.bf16.msra.mxu3 %v1381_v7 }
 0x18b   : > { %648 = vmatmul.bf16.gmra.mxu1 %v496_v28  ;;  %v668_v13 = vmax.f32 %v610_v37, 0.0 }
 0x18d   : > { %v1797_v8 = vadd.f32 %v668_v13, %v1627_v42 }
 0x18e   : > { %1048 = vmatpush.bf16.msra.mxu3 %v1380_v48 }
 0x190   : > { %v611_v9 = vpop.f32.mrf.mxu1 }
 0x191   : > { %v612_v18 = vadd.f32 %v1643_v52, %v611_v9 }
 0x193   : > { %v669_v21 = vmax.f32 %v612_v18, 0.0 }
 0x195   : > { %v1800_v22 = vadd.f32 %v669_v21, %v1630_v43 }
 0x197   : > { %v725_v23 = vpack.c.bf16 %v1800_v22, %v1797_v8 }
 0x198   : > { %v614_v47 = vpop.f32.mrf.mxu1 }
 0x199   : > { %847 = vmatmul.bf16.gmra.mxu2 %v725_v23  ;;  %v615_v26 = vadd.f32 %v1643_v52, %v614_v47 }
 0x19b   : > { %v670_v36 = vmax.f32 %v615_v26, 0.0 }
 0x19d   : > { %v1810_v43 = vadd.f32 %v670_v36, %v1635_v49 }
 0x1a0   : > { %v616_v35 = vpop.f32.mrf.mxu1 }
 0x1a1   : > { %v617_v42 = vadd.f32 %v1643_v52, %v616_v35 }
 0x1a3   : > { %v671_v38 = vmax.f32 %v617_v42, 0.0 }
 0x1a5   : > { %v1813_v15 = vadd.f32 %v671_v38, %v1638_v50 }
 0x1a7   : > { %v726_v16 = vpack.c.bf16 %v1813_v15, %v1810_v43 }
 0x1a8   : > { %v619_v55 = vpop.f32.mrf.mxu1 }
 0x1a9   : > { %852 = vmatmul.bf16.gmra.mxu2 %v726_v16  ;;  %v620_v41 = vadd.f32 %v1643_v52, %v619_v55 }
 0x1ab   : > { %v672_v46 = vmax.f32 %v620_v41, 0.0 }
 0x1ac   : > { %v813_v56 = vpop.f32.mrf.mxu2 }
 0x1ad   : > { %v814_v49 = vadd.f32 %v1821_v44, %v813_v56  ;;  %v1826_v2 = vadd.f32 %v672_v46, %v1656_v3 }
 0x1af   : > { %v893_v5 = vmax.f32 %v814_v49, 0.0 }
 0x1b0   : > { %v621_v45 = vpop.f32.mrf.mxu1 }
 0x1b1   : > { %v622_v50 = vadd.f32 %v1643_v52, %v621_v45  ;;  %v925_v10 = vadd.f32 %v893_v5, %v1650_v62 }
 0x1b3   : > { %v673_v54 = vmax.f32 %v622_v50, 0.0 }
 0x1b4   : > { %v815_v61 = vpop.f32.mrf.mxu2 }
 0x1b5   : > { %v1829_v27 = vadd.f32 %v673_v54, %v1659_v4  ;;  %v816_v28 = vadd.f32 %v1821_v44, %v815_v61 }
 0x1b7   : > { %v894_v6 = vmax.f32 %v816_v28, 0.0  ;;  %v727_v37 = vpack.c.bf16 %v1829_v27, %v1826_v2 }
 0x1b8   : > { %v624_v9 = vpop.f32.mrf.mxu1 }
 0x1b9   : > { %857 = vmatmul.bf16.gmra.mxu2 %v727_v37  ;;  %v926_v13 = vadd.f32 %v894_v6, %v1653_v1  ;;  %v625_v3 = vadd.f32 %v1643_v52, %v624_v9 }
 0x1bb   : > { %v957_v18 = vpack.c.bf16 %v926_v13, %v925_v10  ;;  %v674_v4 = vmax.f32 %v625_v3, 0.0 }
 0x1bc   : > { %v818_v21 = vpop.f32.mrf.mxu2 }
 0x1bd   : > { %1049 = vmatmul.bf16.vlgmr.msra.gmra.mxu3 %v957_v18  ;;  %v819_v23 = vadd.f32 %v1821_v44, %v818_v21  ;;  %v1840_v35 = vadd.f32 %v674_v4, %v1674_v19 }
 0x1bf   : > { %v895_v62 = vmax.f32 %v819_v23, 0.0 }
 0x1c0   : > { %v626_v7 = vpop.f32.mrf.mxu1 }
 0x1c1   : > { %v627_v47 = vadd.f32 %v1643_v52, %v626_v7  ;;  %v927_v55 = vadd.f32 %v895_v62, %v1668_v14 }
 0x1c3   : > { %v675_v48 = vmax.f32 %v627_v47, 0.0 }
 0x1c4   : > { %v820_v26 = vpop.f32.mrf.mxu2 }
 0x1c5   : > { %v1843_v36 = vadd.f32 %v675_v48, %v1677_v20  ;;  %v821_v1 = vadd.f32 %v1821_v44, %v820_v26 }
 0x1c7   : > { %v896_v42 = vmax.f32 %v821_v1, 0.0  ;;  %v728_v38 = vpack.c.bf16 %v1843_v36, %v1840_v35 }
 0x1c8   : > { %v629_v16 = vpop.f32.mrf.mxu1 }
 0x1c9   : > { %862 = vmatmul.bf16.gmra.mxu2 %v728_v38  ;;  %v928_v56 = vadd.f32 %v896_v42, %v1671_v17  ;;  %v630_v19 = vadd.f32 %v1643_v52, %v629_v16 }
 0x1cb   : > { %v958_v41 = vpack.c.bf16 %v928_v56, %v927_v55  ;;  %v676_v20 = vmax.f32 %v630_v19, 0.0 }
 0x1cc   : > { %v823_v45 = vpop.f32.mrf.mxu2 }
 0x1cd   : > { %1054 = vmatmul.bf16.gmra.mxu3 %v958_v41  ;;  %v824_v49 = vadd.f32 %v1821_v44, %v823_v45  ;;  %v1854_v5 = vadd.f32 %v676_v20, %v1692_v33 }
 0x1cf   : > { %v897_v14 = vmax.f32 %v824_v49, 0.0 }
 0x1d0   : > { %v631_v46 = vpop.f32.mrf.mxu1 }
 0x1d1   : > { %v632_v50 = vadd.f32 %v1643_v52, %v631_v46  ;;  %v929_v10 = vadd.f32 %v897_v14, %v1686_v30 }
 0x1d3   : > { %v677_v54 = vmax.f32 %v632_v50, 0.0 }
 0x1d4   : > { %v825_v61 = vpop.f32.mrf.mxu2 }
 0x1d5   : > { %v1857_v28 = vadd.f32 %v677_v54, %v1695_v34  ;;  %v826_v17 = vadd.f32 %v1821_v44, %v825_v61 }
 0x1d7   : > { %v898_v6 = vmax.f32 %v826_v17, 0.0  ;;  %v729_v37 = vpack.c.bf16 %v1857_v28, %v1854_v5 }
 0x1d8   : > { %v634_v9 = vpop.f32.mrf.mxu1 }
 0x1d9   : > { %867 = vmatmul.bf16.gmra.mxu2 %v729_v37  ;;  %v930_v13 = vadd.f32 %v898_v6, %v1689_v31  ;;  %v635_v33 = vadd.f32 %v1643_v52, %v634_v9 }
 0x1db   : > { %v959_v18 = vpack.c.bf16 %v930_v13, %v929_v10  ;;  %v678_v34 = vmax.f32 %v635_v33, 0.0 }
 0x1dc   : > { %v828_v21 = vpop.f32.mrf.mxu2 }
 0x1dd   : > { %1059 = vmatmul.bf16.gmra.mxu3 %v959_v18  ;;  %v829_v7 = vadd.f32 %v1821_v44, %v828_v21  ;;  %v1868_v48 = vadd.f32 %v678_v34, %v1710_v57 }
 0x1df   : > { %v899_v30 = vmax.f32 %v829_v7, 0.0 }
 0x1e0   : > { %v636_v3 = vpop.f32.mrf.mxu1 }
 0x1e1   : > { %v637_v4 = vadd.f32 %v1643_v52, %v636_v3  ;;  %v931_v38 = vadd.f32 %v899_v30, %v1704_v51 }
 0x1e3   : > { %v679_v23 = vmax.f32 %v637_v4, 0.0 }
 0x1e4   : > { %v830_v47 = vpop.f32.mrf.mxu2 }
 0x1e5   : > { %v1871_v26 = vadd.f32 %v679_v23, %v1713_v58  ;;  %v831_v31 = vadd.f32 %v1821_v44, %v830_v47 }
 0x1e7   : > { %v900_v62 = vmax.f32 %v831_v31, 0.0  ;;  %v730_v1 = vpack.c.bf16 %v1871_v26, %v1868_v48 }
 0x1e8   : > { %v639_v42 = vpop.f32.mrf.mxu1 }
 0x1e9   : > { %872 = vmatmul.bf16.gmra.mxu2 %v730_v1  ;;  %v932_v16 = vadd.f32 %v900_v62, %v1707_v53  ;;  %v640_v57 = vadd.f32 %v1643_v52, %v639_v42 }
 0x1eb   : > { %v960_v55 = vpack.c.bf16 %v932_v16, %v931_v38  ;;  %v680_v58 = vmax.f32 %v640_v57, 0.0 }
 0x1ec   : > { %v833_v56 = vpop.f32.mrf.mxu2 }
 0x1ed   : > { %1064 = vmatmul.bf16.gmra.mxu3 %v960_v55  ;;  %v834_v45 = vadd.f32 %v1821_v44, %v833_v56  ;;  %v1882_v49 = vadd.f32 %v680_v58, %v1728_v11 }
 0x1ef   : > { %v901_v51 = vmax.f32 %v834_v45, 0.0 }
 0x1f0   : > { %v641_v41 = vpop.f32.mrf.mxu1 }
 0x1f1   : > { %v642_v19 = vadd.f32 %v1643_v52, %v641_v41  ;;  %v933_v17 = vadd.f32 %v901_v51, %v1722_v39 }
 0x1f3   : > { %v681_v46 = vmax.f32 %v642_v19, 0.0 }
 0x1f4   : > { %v835_v20 = vpop.f32.mrf.mxu2 }
 0x1f5   : > { %v1885_v50 = vadd.f32 %v681_v46, %v1731_v12  ;;  %v836_v53 = vadd.f32 %v1821_v44, %v835_v20 }
 0x1f7   : > { %v902_v54 = vmax.f32 %v836_v53, 0.0  ;;  %v731_v61 = vpack.c.bf16 %v1885_v50, %v1882_v49 }
 0x1f8   : > { %v644_v14 = vpop.f32.mrf.mxu1 }
 0x1f9   : > { %v934_v6 = vadd.f32 %v902_v54, %v1725_v40  ;;  %877 = vmatmul.bf16.gmra.mxu2 %v731_v61  ;;  %v645_v11 = vadd.f32 %v1643_v52, %v644_v14 }
 0x1fb   : > { %v961_v37 = vpack.c.bf16 %v934_v6, %v933_v17  ;;  %v682_v12 = vmax.f32 %v645_v11, 0.0 }
 0x1fc   : > { %v838_v9 = vpop.f32.mrf.mxu2 }
 0x1fd   : > { %1069 = vmatmul.bf16.gmra.mxu3 %v961_v37  ;;  %v839_v13 = vadd.f32 %v1821_v44, %v838_v9  ;;  %v1896_v3 = vadd.f32 %v682_v12, %v1746_v29 }
 0x1ff   : > { %v903_v39 = vmax.f32 %v839_v13, 0.0 }
 0x200   : > { %v646_v10 = vpop.f32.mrf.mxu1 }
 0x201   : > { %v647_v18 = vadd.f32 %v1643_v52, %v646_v10  ;;  %v935_v47 = vadd.f32 %v903_v39, %v1740_v24 }
 0x203   : > { %v683_v21 = vmax.f32 %v647_v18, 0.0 }
 0x204   : > { %v840_v33 = vpop.f32.mrf.mxu2 }
 0x205   : > { %v1899_v40 = vadd.f32 %v683_v21, %v1749_v32  ;;  %v841_v34 = vadd.f32 %v1821_v44, %v840_v33 }
 0x207   : > { %v904_v7 = vmax.f32 %v841_v34, 0.0  ;;  %v732_v4 = vpack.c.bf16 %v1899_v40, %v1896_v3 }
 0x208   : > { %v649_v23 = vpop.f32.mrf.mxu1 }
 0x209   : > { %v936_v30 = vadd.f32 %v904_v7, %v1743_v25  ;;  %882 = vmatmul.bf16.gmra.mxu2 %v732_v4  ;;  %v650_v29 = vadd.f32 %v1643_v52, %v649_v23 }
 0x20b   : > { %v962_v31 = vpack.c.bf16 %v936_v30, %v935_v47  ;;  %v684_v32 = vmax.f32 %v650_v29, 0.0 }
 0x20c   : > { %v843_v62 = vpop.f32.mrf.mxu2 }
 0x20d   : > { %1074 = vmatmul.bf16.gmra.mxu3 %v962_v31  ;;  %v844_v42 = vadd.f32 %v1821_v44, %v843_v62  ;;  %v1910_v56 = vadd.f32 %v684_v32, %v1773_v63 }
 0x20f   : > { %v905_v24 = vmax.f32 %v844_v42, 0.0 }
 0x210   : > { %v651_v1 = vpop.f32.mrf.mxu1 }
 0x211   : > { %v652_v38 = vadd.f32 %v1643_v52, %v651_v1  ;;  %v937_v45 = vadd.f32 %v905_v24, %v1767_v59 }
 0x213   : > { %v685_v16 = vmax.f32 %v652_v38, 0.0 }
 0x214   : > { %v845_v55 = vpop.f32.mrf.mxu2 }
 0x215   : > { %v1913_v25 = vadd.f32 %v685_v16, %v1776_v0  ;;  %v846_v57 = vadd.f32 %v1821_v44, %v845_v55 }
 0x217   : > { %v906_v41 = vmax.f32 %v846_v57, 0.0  ;;  %v733_v58 = vpack.c.bf16 %v1913_v25, %v1910_v56 }
 0x219   : > { %v938_v19 = vadd.f32 %v906_v41, %v1770_v60  ;;  %887 = vmatmul.bf16.gmra.mxu2 %v733_v58 }
 0x21b   : > { %v963_v52 = vpack.c.bf16 %v938_v19, %v937_v45 }
 0x21c   : > { %v848_v46 = vpop.f32.mrf.mxu2 }
 0x21d   : > { %1079 = vmatmul.bf16.gmra.mxu3 %v963_v52  ;;  %v849_v63 = vadd.f32 %v1821_v44, %v848_v46 }
 0x21f   : > { %v907_v51 = vmax.f32 %v849_v63, 0.0 }
 0x221   : > { %v939_v54 = vadd.f32 %v907_v51, %v1797_v8  ;;  %v1931_v8 = vld [vmem:[%s2073_s6] ss:$0 sm:$0xff] }
 0x224   : > { %v850_v20 = vpop.f32.mrf.mxu2 }
 0x225   : > { %v851_v0 = vadd.f32 %v1821_v44, %v850_v20 }
 0x227   : > { %v908_v53 = vmax.f32 %v851_v0, 0.0 }
 0x229   : > { %v940_v61 = vadd.f32 %v908_v53, %v1800_v22 }
 0x22b   : > { %v964_v14 = vpack.c.bf16 %v940_v61, %v939_v54 }
 0x22c   : > { %v853_v59 = vpop.f32.mrf.mxu2 }
 0x22d   : > { %1084 = vmatmul.bf16.gmra.mxu3 %v964_v14  ;;  %v854_v60 = vadd.f32 %v1821_v44, %v853_v59 }
 0x22f   : > { %v909_v6 = vmax.f32 %v854_v60, 0.0 }
 0x231   : > { %v941_v11 = vadd.f32 %v909_v6, %v1810_v43 }
 0x234   : > { %v855_v17 = vpop.f32.mrf.mxu2 }
 0x235   : > { %v856_v37 = vadd.f32 %v1821_v44, %v855_v17 }
 0x237   : > { %v910_v9 = vmax.f32 %v856_v37, 0.0 }
 0x239   : > { %v942_v10 = vadd.f32 %v910_v9, %v1813_v15 }
 0x23b   : > { %v965_v12 = vpack.c.bf16 %v942_v10, %v941_v11 }
 0x23c   : > { %v858_v13 = vpop.f32.mrf.mxu2 }
 0x23d   : > { %1089 = vmatmul.bf16.gmra.mxu3 %v965_v12  ;;  %v859_v43 = vadd.f32 %v1821_v44, %v858_v13 }
 0x23f   : > { %v911_v21 = vmax.f32 %v859_v43, 0.0 }
 0x240   : > { %v1050_v22 = vpop.f32.mrf.mxu3 }
 0x241   : > { %v1051_v15 = vadd.f32 %v1931_v8, %v1050_v22  ;;  %v943_v7 = vadd.f32 %v911_v21, %v1826_v2 }
 0x243   : > { %1131 = vst.msk [vmem:[%s1938_s8] sm:$0xff] %vm1130_vm1, %v1051_v15 }
 0x244   : > { %v860_v18 = vpop.f32.mrf.mxu2 }
 0x245   : > { %v861_v33 = vadd.f32 %v1821_v44, %v860_v18 }
 0x247   : > { %v912_v39 = vmax.f32 %v861_v33, 0.0 }
 0x248   : > { %v1052_v34 = vpop.f32.mrf.mxu3 }
 0x249   : > { %v944_v4 = vadd.f32 %v912_v39, %v1829_v27  ;;  %v1053_v23 = vadd.f32 %v1931_v8, %v1052_v34 }
 0x24b   : > { %1132 = vst.msk [vmem:[%s1938_s8 + $0x8] sm:$0xff] %vm1130_vm1, %v1053_v23  ;;  %v966_v47 = vpack.c.bf16 %v944_v4, %v943_v7 }
 0x24c   : > { %v863_v30 = vpop.f32.mrf.mxu2 }
 0x24d   : > { %1094 = vmatmul.bf16.gmra.mxu3 %v966_v47  ;;  %v864_v62 = vadd.f32 %v1821_v44, %v863_v30 }
 0x24f   : > { %v913_v2 = vmax.f32 %v864_v62, 0.0 }
 0x250   : > { %v1055_v31 = vpop.f32.mrf.mxu3 }
 0x251   : > { %v1056_v29 = vadd.f32 %v1931_v8, %v1055_v31  ;;  %v945_v38 = vadd.f32 %v913_v2, %v1840_v35 }
 0x253   : > { %1133 = vst.msk [vmem:[%s1938_s8 + $0x10] sm:$0xff] %vm1130_vm1, %v1056_v29 }
 0x254   : > { %v865_v1 = vpop.f32.mrf.mxu2 }
 0x255   : > { %v866_v27 = vadd.f32 %v1821_v44, %v865_v1 }
 0x257   : > { %v914_v32 = vmax.f32 %v866_v27, 0.0 }
 0x258   : > { %v1057_v42 = vpop.f32.mrf.mxu3 }
 0x259   : > { %v946_v16 = vadd.f32 %v914_v32, %v1843_v36  ;;  %v1058_v55 = vadd.f32 %v1931_v8, %v1057_v42 }
 0x25b   : > { %1134 = vst.msk [vmem:[%s1938_s8 + $0x18] sm:$0xff] %vm1130_vm1, %v1058_v55  ;;  %v967_v24 = vpack.c.bf16 %v946_v16, %v945_v38 }
 0x25c   : > { %v868_v57 = vpop.f32.mrf.mxu2 }
 0x25d   : > { %1099 = vmatmul.bf16.gmra.mxu3 %v967_v24  ;;  %v869_v58 = vadd.f32 %v1821_v44, %v868_v57 }
 0x25f   : > { %v915_v35 = vmax.f32 %v869_v58, 0.0 }
 0x260   : > { %v1060_v41 = vpop.f32.mrf.mxu3 }
 0x261   : > { %v1061_v45 = vadd.f32 %v1931_v8, %v1060_v41  ;;  %v947_v63 = vadd.f32 %v915_v35, %v1854_v5 }
 0x263   : > { %1135 = vst.msk [vmem:[%s1938_s8 + $0x20] sm:$0xff] %vm1130_vm1, %v1061_v45 }
 0x264   : > { %v870_v19 = vpop.f32.mrf.mxu2 }
 0x265   : > { %v871_v36 = vadd.f32 %v1821_v44, %v870_v19 }
 0x267   : > { %v916_v52 = vmax.f32 %v871_v36, 0.0 }
 0x268   : > { %v1062_v46 = vpop.f32.mrf.mxu3 }
 0x269   : > { %v948_v20 = vadd.f32 %v916_v52, %v1857_v28  ;;  %v1063_v51 = vadd.f32 %v1931_v8, %v1062_v46 }
 0x26b   : > { %1136 = vst.msk [vmem:[%s1938_s8 + $0x28] sm:$0xff] %vm1130_vm1, %v1063_v51  ;;  %v968_v0 = vpack.c.bf16 %v948_v20, %v947_v63 }
 0x26c   : > { %v873_v53 = vpop.f32.mrf.mxu2 }
 0x26d   : > { %1104 = vmatmul.bf16.gmra.mxu3 %v968_v0  ;;  %v874_v61 = vadd.f32 %v1821_v44, %v873_v53 }
 0x26f   : > { %v917_v5 = vmax.f32 %v874_v61, 0.0 }
 0x270   : > { %v1065_v54 = vpop.f32.mrf.mxu3 }
 0x271   : > { %v1066_v14 = vadd.f32 %v1931_v8, %v1065_v54  ;;  %v949_v6 = vadd.f32 %v917_v5, %v1868_v48 }
 0x273   : > { %1137 = vst.msk [vmem:[%s1938_s8 + $0x30] sm:$0xff] %vm1130_vm1, %v1066_v14 }
 0x274   : > { %v875_v59 = vpop.f32.mrf.mxu2 }
 0x275   : > { %v876_v28 = vadd.f32 %v1821_v44, %v875_v59 }
 0x277   : > { %v918_v60 = vmax.f32 %v876_v28, 0.0 }
 0x278   : > { %v1067_v17 = vpop.f32.mrf.mxu3 }
 0x279   : > { %v950_v37 = vadd.f32 %v918_v60, %v1871_v26  ;;  %v1068_v9 = vadd.f32 %v1931_v8, %v1067_v17 }
 0x27b   : > { %1138 = vst.msk [vmem:[%s1938_s8 + $0x38] sm:$0xff] %vm1130_vm1, %v1068_v9  ;;  %v969_v11 = vpack.c.bf16 %v950_v37, %v949_v6 }
 0x27c   : > { %v878_v10 = vpop.f32.mrf.mxu2 }
 0x27d   : > { %1109 = vmatmul.bf16.gmra.mxu3 %v969_v11  ;;  %v879_v13 = vadd.f32 %v1821_v44, %v878_v10 }
 0x27f   : > { %v919_v48 = vmax.f32 %v879_v13, 0.0 }
 0x280   : > { %v1070_v12 = vpop.f32.mrf.mxu3 }
 0x281   : > { %v1071_v22 = vadd.f32 %v1931_v8, %v1070_v12  ;;  %v951_v21 = vadd.f32 %v919_v48, %v1882_v49 }
 0x283   : > { %1139 = vst.msk [vmem:[%s1938_s8 + $0x40] sm:$0xff] %vm1130_vm1, %v1071_v22 }
 0x284   : > { %v880_v43 = vpop.f32.mrf.mxu2 }
 0x285   : > { %v881_v26 = vadd.f32 %v1821_v44, %v880_v43 }
 0x287   : > { %v920_v15 = vmax.f32 %v881_v26, 0.0 }
 0x288   : > { %v1072_v18 = vpop.f32.mrf.mxu3 }
 0x289   : > { %v952_v33 = vadd.f32 %v920_v15, %v1885_v50  ;;  %v1073_v39 = vadd.f32 %v1931_v8, %v1072_v18 }
 0x28b   : > { %1140 = vst.msk [vmem:[%s1938_s8 + $0x48] sm:$0xff] %vm1130_vm1, %v1073_v39  ;;  %v970_v34 = vpack.c.bf16 %v952_v33, %v951_v21 }
 0x28c   : > { %v883_v7 = vpop.f32.mrf.mxu2 }
 0x28d   : > { %1114 = vmatmul.bf16.gmra.mxu3 %v970_v34  ;;  %v884_v23 = vadd.f32 %v1821_v44, %v883_v7 }
 0x28f   : > { %v921_v49 = vmax.f32 %v884_v23, 0.0 }
 0x290   : > { %v1075_v4 = vpop.f32.mrf.mxu3 }
 0x291   : > { %v1076_v47 = vadd.f32 %v1931_v8, %v1075_v4  ;;  %v953_v29 = vadd.f32 %v921_v49, %v1896_v3 }
 0x293   : > { %1141 = vst.msk [vmem:[%s1938_s8 + $0x50] sm:$0xff] %vm1130_vm1, %v1076_v47 }
 0x294   : > { %v885_v30 = vpop.f32.mrf.mxu2 }
 0x295   : > { %v886_v50 = vadd.f32 %v1821_v44, %v885_v30 }
 0x297   : > { %v922_v31 = vmax.f32 %v886_v50, 0.0 }
 0x298   : > { %v1077_v62 = vpop.f32.mrf.mxu3 }
 0x299   : > { %v954_v1 = vadd.f32 %v922_v31, %v1899_v40  ;;  %v1078_v2 = vadd.f32 %v1931_v8, %v1077_v62 }
 0x29b   : > { %1142 = vst.msk [vmem:[%s1938_s8 + $0x58] sm:$0xff] %vm1130_vm1, %v1078_v2  ;;  %v971_v27 = vpack.c.bf16 %v954_v1, %v953_v29 }
 0x29c   : > { %v888_v32 = vpop.f32.mrf.mxu2 }
 0x29d   : > { %1119 = vmatmul.bf16.gmra.mxu3 %v971_v27  ;;  %v889_v38 = vadd.f32 %v1821_v44, %v888_v32 }
 0x29f   : > { %v923_v3 = vmax.f32 %v889_v38, 0.0 }
 0x2a0   : > { %v1080_v42 = vpop.f32.mrf.mxu3 }
 0x2a1   : > { %v1081_v16 = vadd.f32 %v1931_v8, %v1080_v42  ;;  %v955_v41 = vadd.f32 %v923_v3, %v1910_v56 }
 0x2a3   : > { %1143 = vst.msk [vmem:[%s1938_s8 + $0x60] sm:$0xff] %vm1130_vm1, %v1081_v16 }
 0x2a4   : > { %v890_v55 = vpop.f32.mrf.mxu2 }
 0x2a5   : > { %v891_v40 = vadd.f32 %v1821_v44, %v890_v55 }
 0x2a7   : > { %v924_v24 = vmax.f32 %v891_v40, 0.0 }
 0x2a8   : > { %v1082_v57 = vpop.f32.mrf.mxu3 }
 0x2a9   : > { %v956_v58 = vadd.f32 %v924_v24, %v1913_v25  ;;  %v1083_v45 = vadd.f32 %v1931_v8, %v1082_v57 }
 0x2ab   : > { %1144 = vst.msk [vmem:[%s1938_s8 + $0x68] sm:$0xff] %vm1130_vm1, %v1083_v45  ;;  %v972_v19 = vpack.c.bf16 %v956_v58, %v955_v41 }
 0x2ad   : > { %1124 = vmatmul.bf16.gmra.mxu3 %v972_v19 }
 0x2b0   : > { %v1085_v35 = vpop.f32.mrf.mxu3 }
 0x2b1   : > { %v1086_v36 = vadd.f32 %v1931_v8, %v1085_v35 }
 0x2b3   : > { %1145 = vst.msk [vmem:[%s1938_s8 + $0x70] sm:$0xff] %vm1130_vm1, %v1086_v36 }
 0x2b8   : > { %v1087_v44 = vpop.f32.mrf.mxu3 }
 0x2b9   : > { %v1088_v52 = vadd.f32 %v1931_v8, %v1087_v44 }
 0x2bb   : > { %1146 = vst.msk [vmem:[%s1938_s8 + $0x78] sm:$0xff] %vm1130_vm1, %v1088_v52 }
 0x2c0   : > { %v1090_v56 = vpop.f32.mrf.mxu3 }
 0x2c1   : > { %v1091_v25 = vadd.f32 %v1931_v8, %v1090_v56 }
 0x2c3   : > { %1147 = vst.msk [vmem:[%s1938_s8 + $0x80] sm:$0xff] %vm1130_vm1, %v1091_v25 }
 0x2c8   : > { %v1092_v46 = vpop.f32.mrf.mxu3 }
 0x2c9   : > { %v1093_v63 = vadd.f32 %v1931_v8, %v1092_v46 }
 0x2cb   : > { %1148 = vst.msk [vmem:[%s1938_s8 + $0x88] sm:$0xff] %vm1130_vm1, %v1093_v63 }
 0x2d0   : > { %v1095_v20 = vpop.f32.mrf.mxu3 }
 0x2d1   : > { %v1096_v51 = vadd.f32 %v1931_v8, %v1095_v20 }
 0x2d3   : > { %1149 = vst.msk [vmem:[%s1938_s8 + $0x90] sm:$0xff] %vm1130_vm1, %v1096_v51 }
 0x2d8   : > { %v1097_v0 = vpop.f32.mrf.mxu3 }
 0x2d9   : > { %v1098_v53 = vadd.f32 %v1931_v8, %v1097_v0 }
 0x2db   : > { %1150 = vst.msk [vmem:[%s1938_s8 + $0x98] sm:$0xff] %vm1130_vm1, %v1098_v53 }
 0x2e0   : > { %v1100_v54 = vpop.f32.mrf.mxu3 }
 0x2e1   : > { %v1101_v61 = vadd.f32 %v1931_v8, %v1100_v54 }
 0x2e3   : > { %1151 = vst.msk [vmem:[%s1938_s8 + $0xa0] sm:$0xff] %vm1130_vm1, %v1101_v61 }
 0x2e8   : > { %v1102_v14 = vpop.f32.mrf.mxu3 }
 0x2e9   : > { %v1103_v59 = vadd.f32 %v1931_v8, %v1102_v14 }
 0x2eb   : > { %1152 = vst.msk [vmem:[%s1938_s8 + $0xa8] sm:$0xff] %vm1130_vm1, %v1103_v59 }
 0x2f0   : > { %v1105_v5 = vpop.f32.mrf.mxu3 }
 0x2f1   : > { %v1106_v28 = vadd.f32 %v1931_v8, %v1105_v5 }
 0x2f3   : > { %1153 = vst.msk [vmem:[%s1938_s8 + $0xb0] sm:$0xff] %vm1130_vm1, %v1106_v28 }
 0x2f8   : > { %v1107_v60 = vpop.f32.mrf.mxu3 }
 0x2f9   : > { %v1108_v17 = vadd.f32 %v1931_v8, %v1107_v60 }
 0x2fb   : > { %1154 = vst.msk [vmem:[%s1938_s8 + $0xb8] sm:$0xff] %vm1130_vm1, %v1108_v17 }
 0x300   : > { %v1110_v6 = vpop.f32.mrf.mxu3 }
 0x301   : > { %v1111_v37 = vadd.f32 %v1931_v8, %v1110_v6 }
 0x303   : > { %1155 = vst.msk [vmem:[%s1938_s8 + $0xc0] sm:$0xff] %vm1130_vm1, %v1111_v37 }
 0x308   : > { %v1112_v9 = vpop.f32.mrf.mxu3 }
 0x309   : > { %v1113_v11 = vadd.f32 %v1931_v8, %v1112_v9 }
 0x30b   : > { %1156 = vst.msk [vmem:[%s1938_s8 + $0xc8] sm:$0xff] %vm1130_vm1, %v1113_v11 }
 0x310   : > { %v1115_v10 = vpop.f32.mrf.mxu3 }
 0x311   : > { %v1116_v12 = vadd.f32 %v1931_v8, %v1115_v10 }
 0x313   : > { %1157 = vst.msk [vmem:[%s1938_s8 + $0xd0] sm:$0xff] %vm1130_vm1, %v1116_v12 }
 0x318   : > { %v1117_v13 = vpop.f32.mrf.mxu3 }
 0x319   : > { %v1118_v22 = vadd.f32 %v1931_v8, %v1117_v13 }
 0x31b   : > { %1158 = vst.msk [vmem:[%s1938_s8 + $0xd8] sm:$0xff] %vm1130_vm1, %v1118_v22 }
 0x320   : > { %v1120_v43 = vpop.f32.mrf.mxu3 }
 0x321   : > { %v1121_v48 = vadd.f32 %v1931_v8, %v1120_v43 }
 0x323   : > { %1159 = vst.msk [vmem:[%s1938_s8 + $0xe0] sm:$0xff] %vm1130_vm1, %v1121_v48 }
 0x328   : > { %v1122_v26 = vpop.f32.mrf.mxu3 }
 0x329   : > { %v1123_v15 = vadd.f32 %v1931_v8, %v1122_v26 }
 0x32b   : > { %1160 = vst.msk [vmem:[%s1938_s8 + $0xe8] sm:$0xff] %vm1130_vm1, %v1123_v15 }
 0x330   : > { %v1125_v18 = vpop.f32.mrf.mxu3 }
 0x331   : > { %v1126_v21 = vadd.f32 %v1931_v8, %v1125_v18 }
 0x333   : > { %1161 = vst.msk [vmem:[%s1938_s8 + $0xf0] sm:$0xff] %vm1130_vm1, %v1126_v21 }
 0x338   : > { %v1127_v33 = vpop.f32.mrf.mxu3 }
 0x339   : > { %v1128_v39 = vadd.f32 %v1931_v8, %v1127_v33 }
 0x33b   : > { %1162 = vst.msk [vmem:[%s1938_s8 + $0xf8] sm:$0xff] %vm1130_vm1, %v1128_v39 }
 0x33c PF: > { %s17_s24 = sadd.s32 1, %s1406_s24  }
 0x33d   : > { %p14_p4 = scmp.ge.s32.totalorder %s17_s24, 4  }
 0x33f   :  { %16 = sbr.rel (!%p14_p4) target bundleno = 1 (0x1), region = 80 }

// kernel: tpu_custom_call.1
= control target key start
LH: loop header
LB: loop body
LE: loop exit
PB: predicated region body
PF: predicated region fallthrough
CT: control target
= control target key end

     0   :  { %s1448_s24 = smov 0   ;;  %s2067_s0 = inlined_call_operand.vmem [shape: f32[512,16], index: 0, kind: input, shape index: {}]   ;;  %s2068_s1 = inlined_call_operand.vmem [shape: bf16[16,128], index: 1, kind: input, shape index: {}]   ;;  %s2069_s2 = inlined_call_operand.vmem [shape: f32[1,128], index: 2, kind: input, shape index: {}]   ;;  %s2070_s3 = inlined_call_operand.vmem [shape: bf16[2,128,128], index: 3, kind: input, shape index: {}]   ;;  %s2071_s4 = inlined_call_operand.vmem [shape: f32[2,1,128], index: 4, kind: input, shape index: {}]   ;;  %s2072_s5 = inlined_call_operand.vmem [shape: bf16[128,8], index: 5, kind: input, shape index: {}]   ;;  %s2073_s6 = inlined_call_operand.vmem [shape: f32[1,8], index: 6, kind: input, shape index: {}]   ;;  %s2074_s7 = inlined_call_operand.vmem [shape: f32[512,8], index: 7, kind: output, shape index: {}]  }
   0x1 LB: > { %s1219_s25 = sadd.s32 4294967295, %s1406_s24   ;;  %p1223_p0 = scmp.ge.s32.totalorder %s1406_s24, 1  ;;  %s1406_s24 = sphi %s1448_s24, %s17_s24  }
   0x2   : > { %p238_p1 = scmp.lt.s32.totalorder %s1406_s24, 3 }
   0x4   : > { %p239_p2 = pnand %p1223_p0, %p238_p1 }
   0x5   : > { %s1224_s28 = sshll.u32 (!%p239_p2), %s1219_s25, 5 }
   0x6   : > { %242 = sbr.rel (%p239_p2) target bundleno = 828 (0x33c), region = 48  ;;  %p271_p3 = scmp.lt.s32.totalorder (!%p239_p2), %s1224_s28, 63 }
   0xb   : > { %v1363_v0 = vld [vmem:[%s2068_s1] sm:$0xff]  ;;  %s2076_s28 = smov (!%p271_p3, %s1224_s28), 63  ;;  %vm343_vm0 = vcmask 130048   ;;  %v1371_v16 = vld [vmem:[%s2070_s3 + $0x38] sm:$0xff]  ;;  %v1370_v17 = vld [vmem:[%s2070_s3 + $0x30] sm:$0xff]  ;;  %vm1130_vm1 = vcmask 64512  }
   0xc   : > { %399 = vmatpush.bf16.msra.mxu0 %v1363_v0  ;;  %s1225_s29 = sshll.u32 %s2076_s28, 3  ;;  %565 = vmatpush.bf16.msra.mxu1 %v1371_v16  ;;  %v1369_v21 = vld [vmem:[%s2070_s3 + $0x28] sm:$0xff]  ;;  %v1368_v22 = vld [vmem:[%s2070_s3 + $0x20] sm:$0xff]  ;;  %v1367_v23 = vld [vmem:[%s2070_s3 + $0x18] sm:$0xff] }
   0xd   : > { %s1467_s9 = scalar_lea.vmem %s2067_s0, %s1225_s29  ;;  %v1366_v27 = vld [vmem:[%s2070_s3 + $0x10] sm:$0xff]  ;;  %v1365_v28 = vld [vmem:[%s2070_s3 + $0x8] sm:$0xff]  ;;  %v1364_v29 = vld [vmem:[%s2070_s3] sm:$0xff]  ;;  %s1938_s8 = scalar_lea.vmem %s2074_s7, %s1225_s29 }
   0xe   : > { %v283_v1 = vld [vmem:[%s1467_s9] sm:$0xff]  ;;  %v284_v2 = vld [vmem:[%s1467_s9 + $0x8] sm:$0xff]  ;;  %v285_v4 = vld [vmem:[%s1467_s9 + $0x10] sm:$0xff] }
   0xf   : > { %v315_v3 = vpack.c.bf16 %v284_v2, %v283_v1  ;;  %v286_v5 = vld [vmem:[%s1467_s9 + $0x18] sm:$0xff]  ;;  %v287_v7 = vld [vmem:[%s1467_s9 + $0x20] sm:$0xff]  ;;  %v288_v8 = vld [vmem:[%s1467_s9 + $0x28] sm:$0xff] }
  0x10   : > { %v316_v6 = vpack.c.bf16 %v286_v5, %v285_v4  ;;  %v317_v9 = vpack.c.bf16 %v288_v8, %v287_v7  ;;  %v289_v10 = vld [vmem:[%s1467_s9 + $0x30] sm:$0xff]  ;;  %v290_v11 = vld [vmem:[%s1467_s9 + $0x38] sm:$0xff]  ;;  %v291_v13 = vld [vmem:[%s1467_s9 + $0x40] sm:$0xff]  ;;  %566 = vmatpush.bf16.msra.mxu1 %v1370_v17 }
  0x11   : > { %1232 = vmatmul.msk.bf16.vlgmr.msra.gmra.mxu0 %vm343_vm0, %v315_v3  ;;  %v318_v12 = vpack.c.bf16 %v290_v11, %v289_v10  ;;  %v292_v14 = vld [vmem:[%s1467_s9 + $0x48] sm:$0xff]  ;;  %v293_v18 = vld [vmem:[%s1467_s9 + $0x50] sm:$0xff]  ;;  %v294_v19 = vld [vmem:[%s1467_s9 + $0x58] sm:$0xff] }
  0x12   : > { %v319_v15 = vpack.c.bf16 %v292_v14, %v291_v13  ;;  %v320_v20 = vpack.c.bf16 %v294_v19, %v293_v18  ;;  %v295_v24 = vld [vmem:[%s1467_s9 + $0x60] sm:$0xff]  ;;  %v296_v25 = vld [vmem:[%s1467_s9 + $0x68] sm:$0xff]  ;;  %v297_v30 = vld [vmem:[%s1467_s9 + $0x70] sm:$0xff] }
  0x13   : > { %v321_v26 = vpack.c.bf16 %v296_v25, %v295_v24  ;;  %v298_v31 = vld [vmem:[%s1467_s9 + $0x78] sm:$0xff]  ;;  %v299_v33 = vld [vmem:[%s1467_s9 + $0x80] sm:$0xff]  ;;  %v300_v34 = vld [vmem:[%s1467_s9 + $0x88] sm:$0xff] }
  0x14   : > { %567 = vmatpush.bf16.msra.mxu1 %v1369_v21  ;;  %v322_v32 = vpack.c.bf16 %v298_v31, %v297_v30  ;;  %v323_v35 = vpack.c.bf16 %v300_v34, %v299_v33  ;;  %v1523_v37 = vld [vmem:[%s2069_s2] ss:$0 sm:$0xff]  ;;  %v301_v42 = vld [vmem:[%s1467_s9 + $0x90] sm:$0xff]  ;;  %v302_v43 = vld [vmem:[%s1467_s9 + $0x98] sm:$0xff] }
  0x15   : > { %v324_v44 = vpack.c.bf16 %v302_v43, %v301_v42  ;;  %v303_v50 = vld [vmem:[%s1467_s9 + $0xa0] sm:$0xff]  ;;  %v304_v51 = vld [vmem:[%s1467_s9 + $0xa8] sm:$0xff]  ;;  %v305_v58 = vld [vmem:[%s1467_s9 + $0xb0] sm:$0xff] }
  0x16   : > { %v325_v52 = vpack.c.bf16 %v304_v51, %v303_v50  ;;  %v306_v59 = vld [vmem:[%s1467_s9 + $0xb8] sm:$0xff]  ;;  %v307_v2 = vld [vmem:[%s1467_s9 + $0xc0] sm:$0xff]  ;;  %v308_v3 = vld [vmem:[%s1467_s9 + $0xc8] sm:$0xff] }
  0x17   : > { %v326_v60 = vpack.c.bf16 %v306_v59, %v305_v58  ;;  %v327_v4 = vpack.c.bf16 %v308_v3, %v307_v2  ;;  %v309_v10 = vld [vmem:[%s1467_s9 + $0xd0] sm:$0xff]  ;;  %v310_v11 = vld [vmem:[%s1467_s9 + $0xd8] sm:$0xff]  ;;  %v311_v19 = vld [vmem:[%s1467_s9 + $0xe0] sm:$0xff] }
  0x18   : > { %568 = vmatpush.bf16.msra.mxu1 %v1368_v22  ;;  %v1379_v17 = vld [vmem:[%s2070_s3 + $0x78] sm:$0xff]  ;;  %v1378_v21 = vld [vmem:[%s2070_s3 + $0x70] sm:$0xff]  ;;  %v1377_v24 = vld [vmem:[%s2070_s3 + $0x68] sm:$0xff] }
  0x19   : > { %804 = vmatpush.bf16.msra.mxu2 %v1379_v17  ;;  %v1376_v25 = vld [vmem:[%s2070_s3 + $0x60] sm:$0xff]  ;;  %v313_v31 = vld [vmem:[%s1467_s9 + $0xf0] sm:$0xff] }
  0x1a   : > { %v1374_v33 = vld [vmem:[%s2070_s3 + $0x50] sm:$0xff] }
  0x1c   : > { %569 = vmatpush.bf16.msra.mxu1 %v1367_v23 }
  0x1d   : > { %805 = vmatpush.bf16.msra.mxu2 %v1378_v21 }
  0x20   : > { %570 = vmatpush.bf16.msra.mxu1 %v1366_v27 }
  0x21   : > { %1233 = vmatmul.msk.bf16.gmra.mxu0 %vm343_vm0, %v316_v6  ;;  %806 = vmatpush.bf16.msra.mxu2 %v1377_v24 }
  0x24   : > { %571 = vmatpush.bf16.msra.mxu1 %v1365_v28 }
  0x25   : > { %807 = vmatpush.bf16.msra.mxu2 %v1376_v25 }
  0x28   : > { %572 = vmatpush.bf16.msra.mxu1 %v1364_v29  ;;  %v1375_v29 = vld [vmem:[%s2070_s3 + $0x58] sm:$0xff] }
  0x29   : > { %808 = vmatpush.bf16.msra.mxu2 %v1375_v29 }
  0x2d   : > { %809 = vmatpush.bf16.msra.mxu2 %v1374_v33 }
  0x31   : > { %1234 = vmatmul.msk.bf16.gmra.mxu0 %vm343_vm0, %v317_v9 }
  0x41   : > { %1235 = vmatmul.msk.bf16.gmra.mxu0 %vm343_vm0, %v318_v12  ;;  %v328_v12 = vpack.c.bf16 %v310_v11, %v309_v10 }
  0x51   : > { %1236 = vmatmul.msk.bf16.gmra.mxu0 %vm343_vm0, %v319_v15 }
  0x61   : > { %1237 = vmatmul.msk.bf16.gmra.mxu0 %vm343_vm0, %v320_v20  ;;  %v312_v20 = vld [vmem:[%s1467_s9 + $0xe8] sm:$0xff] }
  0x62   : > { %v329_v22 = vpack.c.bf16 %v312_v20, %v311_v19 }
  0x71   : > { %1238 = vmatmul.msk.bf16.gmra.mxu0 %vm343_vm0, %v321_v26 }
  0x81   : > { %1239 = vmatmul.msk.bf16.gmra.mxu0 %vm343_vm0, %v322_v32  ;;  %v314_v32 = vld [vmem:[%s1467_s9 + $0xf8] sm:$0xff] }
  0x82   : > { %v330_v34 = vpack.c.bf16 %v314_v32, %v313_v31 }
  0x8e   : > { %v401_v36 = vpop.f32.mrf.mxu0 }
  0x8f   : > { %v1526_v39 = vadd.f32 %v1523_v37, %v401_v36  ;;  %v1373_v36 = vld [vmem:[%s2070_s3 + $0x48] sm:$0xff] }
  0x90   : > { %810 = vmatpush.bf16.msra.mxu2 %v1373_v36 }
  0x91   : > { %1240 = vmatmul.msk.bf16.gmra.mxu0 %vm343_vm0, %v323_v35 }
  0x96   : > { %v403_v38 = vpop.f32.mrf.mxu0 }
  0x97   : > { %v1529_v40 = vadd.f32 %v1523_v37, %v403_v38  ;;  %v1372_v38 = vld [vmem:[%s2070_s3 + $0x40] sm:$0xff] }
  0x98   : > { %811 = vmatpush.bf16.msra.mxu2 %v1372_v38 }
  0x99   : > { %v481_v41 = vpack.c.bf16 %v1529_v40, %v1526_v39 }
  0x9b   : > { %573 = vmatmul.bf16.vlgmr.msra.gmra.mxu1 %v481_v41 }
  0x9e   : > { %v406_v45 = vpop.f32.mrf.mxu0 }
  0x9f   : > { %v1537_v47 = vadd.f32 %v1523_v37, %v406_v45 }
  0xa1   : > { %1241 = vmatmul.msk.bf16.gmra.mxu0 %vm343_vm0, %v324_v44 }
  0xa6   : > { %v408_v46 = vpop.f32.mrf.mxu0 }
  0xa7   : > { %v1540_v48 = vadd.f32 %v1523_v37, %v408_v46 }
  0xa9   : > { %v482_v49 = vpack.c.bf16 %v1540_v48, %v1537_v47 }
  0xab   : > { %578 = vmatmul.bf16.gmra.mxu1 %v482_v49 }
  0xae   : > { %v411_v53 = vpop.f32.mrf.mxu0 }
  0xaf   : > { %v1548_v55 = vadd.f32 %v1523_v37, %v411_v53 }
  0xb1   : > { %1242 = vmatmul.msk.bf16.gmra.mxu0 %vm343_vm0, %v325_v52  ;;  %v1643_v52 = vld [vmem:[%s2071_s4] ss:$0 sm:$0xff] }
  0xb6   : > { %v413_v54 = vpop.f32.mrf.mxu0 }
  0xb7   : > { %v1551_v56 = vadd.f32 %v1523_v37, %v413_v54 }
  0xb9   : > { %v483_v57 = vpack.c.bf16 %v1551_v56, %v1548_v55 }
  0xbb   : > { %583 = vmatmul.bf16.gmra.mxu1 %v483_v57 }
  0xbe   : > { %v416_v61 = vpop.f32.mrf.mxu0 }
  0xbf   : > { %v1559_v63 = vadd.f32 %v1523_v37, %v416_v61 }
  0xc1   : > { %1243 = vmatmul.msk.bf16.gmra.mxu0 %vm343_vm0, %v326_v60 }
  0xc6   : > { %v418_v62 = vpop.f32.mrf.mxu0 }
  0xc7   : > { %v1562_v0 = vadd.f32 %v1523_v37, %v418_v62 }
  0xc9   : > { %v484_v1 = vpack.c.bf16 %v1562_v0, %v1559_v63 }
  0xcb   : > { %588 = vmatmul.bf16.gmra.mxu1 %v484_v1 }
  0xce   : > { %v421_v5 = vpop.f32.mrf.mxu0 }
  0xcf   : > { %v1570_v7 = vadd.f32 %v1523_v37, %v421_v5 }
  0xd1   : > { %1244 = vmatmul.msk.bf16.gmra.mxu0 %vm343_vm0, %v327_v4 }
  0xd6   : > { %v423_v6 = vpop.f32.mrf.mxu0 }
  0xd7   : > { %v1573_v8 = vadd.f32 %v1523_v37, %v423_v6 }
  0xd9   : > { %v485_v9 = vpack.c.bf16 %v1573_v8, %v1570_v7 }
  0xdb   : > { %593 = vmatmul.bf16.gmra.mxu1 %v485_v9 }
  0xde   : > { %v426_v13 = vpop.f32.mrf.mxu0 }
  0xdf   : > { %v1581_v15 = vadd.f32 %v1523_v37, %v426_v13 }
  0xe1   : > { %1245 = vmatmul.msk.bf16.gmra.mxu0 %vm343_vm0, %v328_v12 }
  0xe6   : > { %v428_v14 = vpop.f32.mrf.mxu0 }
  0xe7   : > { %v1584_v16 = vadd.f32 %v1523_v37, %v428_v14 }
  0xe9   : > { %v486_v18 = vpack.c.bf16 %v1584_v16, %v1581_v15 }
  0xeb   : > { %598 = vmatmul.bf16.gmra.mxu1 %v486_v18 }
  0xee   : > { %v431_v23 = vpop.f32.mrf.mxu0 }
  0xef   : > { %v1604_v27 = vadd.f32 %v1523_v37, %v431_v23 }
  0xf1   : > { %1246 = vmatmul.msk.bf16.gmra.mxu0 %vm343_vm0, %v329_v22 }
  0xf6   : > { %v433_v26 = vpop.f32.mrf.mxu0 }
  0xf7   : > { %v1607_v28 = vadd.f32 %v1523_v37, %v433_v26 }
  0xf9   : > { %v487_v30 = vpack.c.bf16 %v1607_v28, %v1604_v27 }
  0xfb   : > { %603 = vmatmul.bf16.gmra.mxu1 %v487_v30 }
  0xfe   : > { %v436_v35 = vpop.f32.mrf.mxu0 }
  0xff   : > { %v1627_v42 = vadd.f32 %v1523_v37, %v436_v35 }
 0x101   : > { %1247 = vmatmul.msk.bf16.gmra.mxu0 %vm343_vm0, %v330_v34 }
 0x106   : > { %v438_v41 = vpop.f32.mrf.mxu0 }
 0x107   : > { %v1630_v43 = vadd.f32 %v1523_v37, %v438_v41 }
 0x109   : > { %v488_v44 = vpack.c.bf16 %v1630_v43, %v1627_v42 }
 0x10b   : > { %608 = vmatmul.bf16.gmra.mxu1 %v488_v44 }
 0x10e   : > { %v441_v45 = vpop.f32.mrf.mxu0 }
 0x10f   : > { %v1635_v49 = vadd.f32 %v1523_v37, %v441_v45 }
 0x116   : > { %v443_v46 = vpop.f32.mrf.mxu0 }
 0x117   : > { %v1638_v50 = vadd.f32 %v1523_v37, %v443_v46 }
 0x118   : > { %v574_v51 = vpop.f32.mrf.mxu1 }
 0x119   : > { %v489_v53 = vpack.c.bf16 %v1638_v50, %v1635_v49  ;;  %v575_v54 = vadd.f32 %v1643_v52, %v574_v51 }
 0x11b   : > { %613 = vmatmul.bf16.gmra.mxu1 %v489_v53  ;;  %v654_v59 = vmax.f32 %v575_v54, 0.0 }
 0x11d   : > { %v1650_v62 = vadd.f32 %v654_v59, %v1526_v39 }
 0x11e   : > { %v446_v57 = vpop.f32.mrf.mxu0 }
 0x11f   : > { %v1656_v3 = vadd.f32 %v1523_v37, %v446_v57 }
 0x120   : > { %v576_v58 = vpop.f32.mrf.mxu1 }
 0x121   : > { %v577_v60 = vadd.f32 %v1643_v52, %v576_v58 }
 0x123   : > { %v655_v61 = vmax.f32 %v577_v60, 0.0 }
 0x125   : > { %v1653_v1 = vadd.f32 %v655_v61, %v1529_v40 }
 0x126   : > { %v448_v2 = vpop.f32.mrf.mxu0 }
 0x127   : > { %v1659_v4 = vadd.f32 %v1523_v37, %v448_v2  ;;  %v718_v5 = vpack.c.bf16 %v1653_v1, %v1650_v62 }
 0x128   : > { %v579_v6 = vpop.f32.mrf.mxu1 }
 0x129   : > { %812 = vmatmul.bf16.vlgmr.msra.gmra.mxu2 %v718_v5  ;;  %v490_v9 = vpack.c.bf16 %v1659_v4, %v1656_v3  ;;  %v580_v39 = vadd.f32 %v1643_v52, %v579_v6 }
 0x12b   : > { %618 = vmatmul.bf16.gmra.mxu1 %v490_v9  ;;  %v656_v11 = vmax.f32 %v580_v39, 0.0 }
 0x12d   : > { %v1668_v14 = vadd.f32 %v656_v11, %v1537_v47 }
 0x12e   : > { %v451_v40 = vpop.f32.mrf.mxu0 }
 0x12f   : > { %v1674_v19 = vadd.f32 %v1523_v37, %v451_v40 }
 0x130   : > { %v581_v10 = vpop.f32.mrf.mxu1 }
 0x131   : > { %v582_v12 = vadd.f32 %v1643_v52, %v581_v10 }
 0x133   : > { %v657_v13 = vmax.f32 %v582_v12, 0.0 }
 0x135   : > { %v1671_v17 = vadd.f32 %v657_v13, %v1540_v48 }
 0x136   : > { %v453_v18 = vpop.f32.mrf.mxu0 }
 0x137   : > { %v1677_v20 = vadd.f32 %v1523_v37, %v453_v18  ;;  %v719_v21 = vpack.c.bf16 %v1671_v17, %v1668_v14 }
 0x138   : > { %v584_v22 = vpop.f32.mrf.mxu1 }
 0x139   : > { %817 = vmatmul.bf16.gmra.mxu2 %v719_v21  ;;  %v491_v23 = vpack.c.bf16 %v1677_v20, %v1674_v19  ;;  %v585_v47 = vadd.f32 %v1643_v52, %v584_v22 }
 0x13b   : > { %623 = vmatmul.bf16.gmra.mxu1 %v491_v23  ;;  %v658_v25 = vmax.f32 %v585_v47, 0.0 }
 0x13d   : > { %v1686_v30 = vadd.f32 %v658_v25, %v1548_v55 }
 0x13e   : > { %v456_v48 = vpop.f32.mrf.mxu0 }
 0x13f   : > { %v1692_v33 = vadd.f32 %v1523_v37, %v456_v48 }
 0x140   : > { %v586_v24 = vpop.f32.mrf.mxu1 }
 0x141   : > { %v587_v26 = vadd.f32 %v1643_v52, %v586_v24 }
 0x143   : > { %v659_v29 = vmax.f32 %v587_v26, 0.0 }
 0x145   : > { %v1689_v31 = vadd.f32 %v659_v29, %v1551_v56 }
 0x146   : > { %v458_v32 = vpop.f32.mrf.mxu0 }
 0x147   : > { %v1695_v34 = vadd.f32 %v1523_v37, %v458_v32  ;;  %v720_v35 = vpack.c.bf16 %v1689_v31, %v1686_v30 }
 0x148   : > { %v589_v36 = vpop.f32.mrf.mxu1 }
 0x149   : > { %822 = vmatmul.bf16.gmra.mxu2 %v720_v35  ;;  %v492_v38 = vpack.c.bf16 %v1695_v34, %v1692_v33  ;;  %v590_v55 = vadd.f32 %v1643_v52, %v589_v36 }
 0x14b   : > { %628 = vmatmul.bf16.gmra.mxu1 %v492_v38  ;;  %v660_v44 = vmax.f32 %v590_v55, 0.0 }
 0x14d   : > { %v1704_v51 = vadd.f32 %v660_v44, %v1559_v63 }
 0x14e   : > { %v461_v56 = vpop.f32.mrf.mxu0 }
 0x14f   : > { %v1710_v57 = vadd.f32 %v1523_v37, %v461_v56 }
 0x150   : > { %v591_v41 = vpop.f32.mrf.mxu1 }
 0x151   : > { %v592_v45 = vadd.f32 %v1643_v52, %v591_v41  ;;  %v1386_v41 = vld [vmem:[%s2072_s5 + $0x30] sm:$0xff] }
 0x153   : > { %v661_v46 = vmax.f32 %v592_v45, 0.0 }
 0x155   : > { %v1707_v53 = vadd.f32 %v661_v46, %v1562_v0 }
 0x156   : > { %v463_v54 = vpop.f32.mrf.mxu0 }
 0x157   : > { %v1713_v58 = vadd.f32 %v1523_v37, %v463_v54  ;;  %v721_v59 = vpack.c.bf16 %v1707_v53, %v1704_v51  ;;  %v1385_v54 = vld [vmem:[%s2072_s5 + $0x28] sm:$0xff] }
 0x158   : > { %v594_v60 = vpop.f32.mrf.mxu1 }
 0x159   : > { %v493_v61 = vpack.c.bf16 %v1713_v58, %v1710_v57  ;;  %827 = vmatmul.bf16.gmra.mxu2 %v721_v59  ;;  %v595_v63 = vadd.f32 %v1643_v52, %v594_v60 }
 0x15b   : > { %633 = vmatmul.bf16.gmra.mxu1 %v493_v61  ;;  %v662_v5 = vmax.f32 %v595_v63, 0.0 }
 0x15d   : > { %v1722_v39 = vadd.f32 %v662_v5, %v1570_v7 }
 0x15e   : > { %v466_v0 = vpop.f32.mrf.mxu0 }
 0x15f   : > { %v1728_v11 = vadd.f32 %v1523_v37, %v466_v0 }
 0x160   : > { %v596_v2 = vpop.f32.mrf.mxu1 }
 0x161   : > { %v597_v6 = vadd.f32 %v1643_v52, %v596_v2 }
 0x163   : > { %v663_v9 = vmax.f32 %v597_v6, 0.0  ;;  %v1383_v6 = vld [vmem:[%s2072_s5 + $0x18] sm:$0xff] }
 0x165   : > { %v1725_v40 = vadd.f32 %v663_v9, %v1573_v8 }
 0x166   : > { %v468_v10 = vpop.f32.mrf.mxu0 }
 0x167   : > { %v1731_v12 = vadd.f32 %v1523_v37, %v468_v10  ;;  %v722_v13 = vpack.c.bf16 %v1725_v40, %v1722_v39  ;;  %v1382_v10 = vld [vmem:[%s2072_s5 + $0x10] sm:$0xff] }
 0x168   : > { %v599_v18 = vpop.f32.mrf.mxu1 }
 0x169   : > { %v494_v21 = vpack.c.bf16 %v1731_v12, %v1728_v11  ;;  %832 = vmatmul.bf16.gmra.mxu2 %v722_v13  ;;  %v600_v7 = vadd.f32 %v1643_v52, %v599_v18 }
 0x16b   : > { %638 = vmatmul.bf16.gmra.mxu1 %v494_v21  ;;  %v664_v23 = vmax.f32 %v600_v7, 0.0  ;;  %v1381_v7 = vld [vmem:[%s2072_s5 + $0x8] sm:$0xff] }
 0x16d   : > { %v1740_v24 = vadd.f32 %v664_v23, %v1581_v15  ;;  %v1387_v15 = vld [vmem:[%s2072_s5 + $0x38] sm:$0xff] }
 0x16e   : > { %v471_v8 = vpop.f32.mrf.mxu0  ;;  %1041 = vmatpush.bf16.msra.mxu3 %v1387_v15 }
 0x16f   : > { %v1746_v29 = vadd.f32 %v1523_v37, %v471_v8 }
 0x170   : > { %v601_v22 = vpop.f32.mrf.mxu1 }
 0x171   : > { %v602_v47 = vadd.f32 %v1643_v52, %v601_v22 }
 0x172   : > { %1042 = vmatpush.bf16.msra.mxu3 %v1386_v41 }
 0x173   : > { %v665_v48 = vmax.f32 %v602_v47, 0.0 }
 0x175   : > { %v1743_v25 = vadd.f32 %v665_v48, %v1584_v16  ;;  %v1380_v48 = vld [vmem:[%s2072_s5] sm:$0xff] }
 0x176   : > { %v473_v26 = vpop.f32.mrf.mxu0  ;;  %1043 = vmatpush.bf16.msra.mxu3 %v1385_v54 }
 0x177   : > { %v1749_v32 = vadd.f32 %v1523_v37, %v473_v26  ;;  %v723_v35 = vpack.c.bf16 %v1743_v25, %v1740_v24 }
 0x178   : > { %v604_v36 = vpop.f32.mrf.mxu1 }
 0x179   : > { %v495_v38 = vpack.c.bf16 %v1749_v32, %v1746_v29  ;;  %837 = vmatmul.bf16.gmra.mxu2 %v723_v35  ;;  %v605_v16 = vadd.f32 %v1643_v52, %v604_v36 }
 0x17b   : > { %643 = vmatmul.bf16.gmra.mxu1 %v495_v38  ;;  %v666_v44 = vmax.f32 %v605_v16, 0.0 }
 0x17d   : > { %v1767_v59 = vadd.f32 %v666_v44, %v1604_v27  ;;  %v1384_v27 = vld [vmem:[%s2072_s5 + $0x20] sm:$0xff] }
 0x17e   : > { %v476_v55 = vpop.f32.mrf.mxu0  ;;  %1044 = vmatpush.bf16.msra.mxu3 %v1384_v27  ;;  %v1821_v44 = vld [vmem:[%s2071_s4 + $0x1] ss:$0 sm:$0xff] }
 0x17f   : > { %v1773_v63 = vadd.f32 %v1523_v37, %v476_v55 }
 0x180   : > { %v606_v56 = vpop.f32.mrf.mxu1 }
 0x181   : > { %v607_v45 = vadd.f32 %v1643_v52, %v606_v56 }
 0x182   : > { %1045 = vmatpush.bf16.msra.mxu3 %v1383_v6 }
 0x183   : > { %v667_v46 = vmax.f32 %v607_v45, 0.0 }
 0x185   : > { %v1770_v60 = vadd.f32 %v667_v46, %v1607_v28 }
 0x186   : > { %v478_v61 = vpop.f32.mrf.mxu0  ;;  %1046 = vmatpush.bf16.msra.mxu3 %v1382_v10 }
 0x187   : > { %v1776_v0 = vadd.f32 %v1523_v37, %v478_v61  ;;  %v724_v2 = vpack.c.bf16 %v1770_v60, %v1767_v59 }
 0x188   : > { %v609_v5 = vpop.f32.mrf.mxu1 }
 0x189   : > { %v496_v28 = vpack.c.bf16 %v1776_v0, %v1773_v63  ;;  %842 = vmatmul.bf16.gmra.mxu2 %v724_v2  ;;  %v610_v37 = vadd.f32 %v1643_v52, %v609_v5 }
 0x18a   : > { %1047 = vmatpush.bf16.msra.mxu3 %v1381_v7 }
 0x18b   : > { %648 = vmatmul.bf16.gmra.mxu1 %v496_v28  ;;  %v668_v13 = vmax.f32 %v610_v37, 0.0 }
 0x18d   : > { %v1797_v8 = vadd.f32 %v668_v13, %v1627_v42 }
 0x18e   : > { %1048 = vmatpush.bf16.msra.mxu3 %v1380_v48 }
 0x190   : > { %v611_v9 = vpop.f32.mrf.mxu1 }
 0x191   : > { %v612_v18 = vadd.f32 %v1643_v52, %v611_v9 }
 0x193   : > { %v669_v21 = vmax.f32 %v612_v18, 0.0 }
 0x195   : > { %v1800_v22 = vadd.f32 %v669_v21, %v1630_v43 }
 0x197   : > { %v725_v23 = vpack.c.bf16 %v1800_v22, %v1797_v8 }
 0x198   : > { %v614_v47 = vpop.f32.mrf.mxu1 }
 0x199   : > { %847 = vmatmul.bf16.gmra.mxu2 %v725_v23  ;;  %v615_v26 = vadd.f32 %v1643_v52, %v614_v47 }
 0x19b   : > { %v670_v36 = vmax.f32 %v615_v26, 0.0 }
 0x19d   : > { %v1810_v43 = vadd.f32 %v670_v36, %v1635_v49 }
 0x1a0   : > { %v616_v35 = vpop.f32.mrf.mxu1 }
 0x1a1   : > { %v617_v42 = vadd.f32 %v1643_v52, %v616_v35 }
 0x1a3   : > { %v671_v38 = vmax.f32 %v617_v42, 0.0 }
 0x1a5   : > { %v1813_v15 = vadd.f32 %v671_v38, %v1638_v50 }
 0x1a7   : > { %v726_v16 = vpack.c.bf16 %v1813_v15, %v1810_v43 }
 0x1a8   : > { %v619_v55 = vpop.f32.mrf.mxu1 }
 0x1a9   : > { %852 = vmatmul.bf16.gmra.mxu2 %v726_v16  ;;  %v620_v41 = vadd.f32 %v1643_v52, %v619_v55 }
 0x1ab   : > { %v672_v46 = vmax.f32 %v620_v41, 0.0 }
 0x1ac   : > { %v813_v56 = vpop.f32.mrf.mxu2 }
 0x1ad   : > { %v814_v49 = vadd.f32 %v1821_v44, %v813_v56  ;;  %v1826_v2 = vadd.f32 %v672_v46, %v1656_v3 }
 0x1af   : > { %v893_v5 = vmax.f32 %v814_v49, 0.0 }
 0x1b0   : > { %v621_v45 = vpop.f32.mrf.mxu1 }
 0x1b1   : > { %v622_v50 = vadd.f32 %v1643_v52, %v621_v45  ;;  %v925_v10 = vadd.f32 %v893_v5, %v1650_v62 }
 0x1b3   : > { %v673_v54 = vmax.f32 %v622_v50, 0.0 }
 0x1b4   : > { %v815_v61 = vpop.f32.mrf.mxu2 }
 0x1b5   : > { %v1829_v27 = vadd.f32 %v673_v54, %v1659_v4  ;;  %v816_v28 = vadd.f32 %v1821_v44, %v815_v61 }
 0x1b7   : > { %v894_v6 = vmax.f32 %v816_v28, 0.0  ;;  %v727_v37 = vpack.c.bf16 %v1829_v27, %v1826_v2 }
 0x1b8   : > { %v624_v9 = vpop.f32.mrf.mxu1 }
 0x1b9   : > { %857 = vmatmul.bf16.gmra.mxu2 %v727_v37  ;;  %v926_v13 = vadd.f32 %v894_v6, %v1653_v1  ;;  %v625_v3 = vadd.f32 %v1643_v52, %v624_v9 }
 0x1bb   : > { %v957_v18 = vpack.c.bf16 %v926_v13, %v925_v10  ;;  %v674_v4 = vmax.f32 %v625_v3, 0.0 }
 0x1bc   : > { %v818_v21 = vpop.f32.mrf.mxu2 }
 0x1bd   : > { %1049 = vmatmul.bf16.vlgmr.msra.gmra.mxu3 %v957_v18  ;;  %v819_v23 = vadd.f32 %v1821_v44, %v818_v21  ;;  %v1840_v35 = vadd.f32 %v674_v4, %v1674_v19 }
 0x1bf   : > { %v895_v62 = vmax.f32 %v819_v23, 0.0 }
 0x1c0   : > { %v626_v7 = vpop.f32.mrf.mxu1 }
 0x1c1   : > { %v627_v47 = vadd.f32 %v1643_v52, %v626_v7  ;;  %v927_v55 = vadd.f32 %v895_v62, %v1668_v14 }
 0x1c3   : > { %v675_v48 = vmax.f32 %v627_v47, 0.0 }
 0x1c4   : > { %v820_v26 = vpop.f32.mrf.mxu2 }
 0x1c5   : > { %v1843_v36 = vadd.f32 %v675_v48, %v1677_v20  ;;  %v821_v1 = vadd.f32 %v1821_v44, %v820_v26 }
 0x1c7   : > { %v896_v42 = vmax.f32 %v821_v1, 0.0  ;;  %v728_v38 = vpack.c.bf16 %v1843_v36, %v1840_v35 }
 0x1c8   : > { %v629_v16 = vpop.f32.mrf.mxu1 }
 0x1c9   : > { %862 = vmatmul.bf16.gmra.mxu2 %v728_v38  ;;  %v928_v56 = vadd.f32 %v896_v42, %v1671_v17  ;;  %v630_v19 = vadd.f32 %v1643_v52, %v629_v16 }
 0x1cb   : > { %v958_v41 = vpack.c.bf16 %v928_v56, %v927_v55  ;;  %v676_v20 = vmax.f32 %v630_v19, 0.0 }
 0x1cc   : > { %v823_v45 = vpop.f32.mrf.mxu2 }
 0x1cd   : > { %1054 = vmatmul.bf16.gmra.mxu3 %v958_v41  ;;  %v824_v49 = vadd.f32 %v1821_v44, %v823_v45  ;;  %v1854_v5 = vadd.f32 %v676_v20, %v1692_v33 }
 0x1cf   : > { %v897_v14 = vmax.f32 %v824_v49, 0.0 }
 0x1d0   : > { %v631_v46 = vpop.f32.mrf.mxu1 }
 0x1d1   : > { %v632_v50 = vadd.f32 %v1643_v52, %v631_v46  ;;  %v929_v10 = vadd.f32 %v897_v14, %v1686_v30 }
 0x1d3   : > { %v677_v54 = vmax.f32 %v632_v50, 0.0 }
 0x1d4   : > { %v825_v61 = vpop.f32.mrf.mxu2 }
 0x1d5   : > { %v1857_v28 = vadd.f32 %v677_v54, %v1695_v34  ;;  %v826_v17 = vadd.f32 %v1821_v44, %v825_v61 }
 0x1d7   : > { %v898_v6 = vmax.f32 %v826_v17, 0.0  ;;  %v729_v37 = vpack.c.bf16 %v1857_v28, %v1854_v5 }
 0x1d8   : > { %v634_v9 = vpop.f32.mrf.mxu1 }
 0x1d9   : > { %867 = vmatmul.bf16.gmra.mxu2 %v729_v37  ;;  %v930_v13 = vadd.f32 %v898_v6, %v1689_v31  ;;  %v635_v33 = vadd.f32 %v1643_v52, %v634_v9 }
 0x1db   : > { %v959_v18 = vpack.c.bf16 %v930_v13, %v929_v10  ;;  %v678_v34 = vmax.f32 %v635_v33, 0.0 }
 0x1dc   : > { %v828_v21 = vpop.f32.mrf.mxu2 }
 0x1dd   : > { %1059 = vmatmul.bf16.gmra.mxu3 %v959_v18  ;;  %v829_v7 = vadd.f32 %v1821_v44, %v828_v21  ;;  %v1868_v48 = vadd.f32 %v678_v34, %v1710_v57 }
 0x1df   : > { %v899_v30 = vmax.f32 %v829_v7, 0.0 }
 0x1e0   : > { %v636_v3 = vpop.f32.mrf.mxu1 }
 0x1e1   : > { %v637_v4 = vadd.f32 %v1643_v52, %v636_v3  ;;  %v931_v38 = vadd.f32 %v899_v30, %v1704_v51 }
 0x1e3   : > { %v679_v23 = vmax.f32 %v637_v4, 0.0 }
 0x1e4   : > { %v830_v47 = vpop.f32.mrf.mxu2 }
 0x1e5   : > { %v1871_v26 = vadd.f32 %v679_v23, %v1713_v58  ;;  %v831_v31 = vadd.f32 %v1821_v44, %v830_v47 }
 0x1e7   : > { %v900_v62 = vmax.f32 %v831_v31, 0.0  ;;  %v730_v1 = vpack.c.bf16 %v1871_v26, %v1868_v48 }
 0x1e8   : > { %v639_v42 = vpop.f32.mrf.mxu1 }
 0x1e9   : > { %872 = vmatmul.bf16.gmra.mxu2 %v730_v1  ;;  %v932_v16 = vadd.f32 %v900_v62, %v1707_v53  ;;  %v640_v57 = vadd.f32 %v1643_v52, %v639_v42 }
 0x1eb   : > { %v960_v55 = vpack.c.bf16 %v932_v16, %v931_v38  ;;  %v680_v58 = vmax.f32 %v640_v57, 0.0 }
 0x1ec   : > { %v833_v56 = vpop.f32.mrf.mxu2 }
 0x1ed   : > { %1064 = vmatmul.bf16.gmra.mxu3 %v960_v55  ;;  %v834_v45 = vadd.f32 %v1821_v44, %v833_v56  ;;  %v1882_v49 = vadd.f32 %v680_v58, %v1728_v11 }
 0x1ef   : > { %v901_v51 = vmax.f32 %v834_v45, 0.0 }
 0x1f0   : > { %v641_v41 = vpop.f32.mrf.mxu1 }
 0x1f1   : > { %v642_v19 = vadd.f32 %v1643_v52, %v641_v41  ;;  %v933_v17 = vadd.f32 %v901_v51, %v1722_v39 }
 0x1f3   : > { %v681_v46 = vmax.f32 %v642_v19, 0.0 }
 0x1f4   : > { %v835_v20 = vpop.f32.mrf.mxu2 }
 0x1f5   : > { %v1885_v50 = vadd.f32 %v681_v46, %v1731_v12  ;;  %v836_v53 = vadd.f32 %v1821_v44, %v835_v20 }
 0x1f7   : > { %v902_v54 = vmax.f32 %v836_v53, 0.0  ;;  %v731_v61 = vpack.c.bf16 %v1885_v50, %v1882_v49 }
 0x1f8   : > { %v644_v14 = vpop.f32.mrf.mxu1 }
 0x1f9   : > { %v934_v6 = vadd.f32 %v902_v54, %v1725_v40  ;;  %877 = vmatmul.bf16.gmra.mxu2 %v731_v61  ;;  %v645_v11 = vadd.f32 %v1643_v52, %v644_v14 }
 0x1fb   : > { %v961_v37 = vpack.c.bf16 %v934_v6, %v933_v17  ;;  %v682_v12 = vmax.f32 %v645_v11, 0.0 }
 0x1fc   : > { %v838_v9 = vpop.f32.mrf.mxu2 }
 0x1fd   : > { %1069 = vmatmul.bf16.gmra.mxu3 %v961_v37  ;;  %v839_v13 = vadd.f32 %v1821_v44, %v838_v9  ;;  %v1896_v3 = vadd.f32 %v682_v12, %v1746_v29 }
 0x1ff   : > { %v903_v39 = vmax.f32 %v839_v13, 0.0 }
 0x200   : > { %v646_v10 = vpop.f32.mrf.mxu1 }
 0x201   : > { %v647_v18 = vadd.f32 %v1643_v52, %v646_v10  ;;  %v935_v47 = vadd.f32 %v903_v39, %v1740_v24 }
 0x203   : > { %v683_v21 = vmax.f32 %v647_v18, 0.0 }
 0x204   : > { %v840_v33 = vpop.f32.mrf.mxu2 }
 0x205   : > { %v1899_v40 = vadd.f32 %v683_v21, %v1749_v32  ;;  %v841_v34 = vadd.f32 %v1821_v44, %v840_v33 }
 0x207   : > { %v904_v7 = vmax.f32 %v841_v34, 0.0  ;;  %v732_v4 = vpack.c.bf16 %v1899_v40, %v1896_v3 }
 0x208   : > { %v649_v23 = vpop.f32.mrf.mxu1 }
 0x209   : > { %v936_v30 = vadd.f32 %v904_v7, %v1743_v25  ;;  %882 = vmatmul.bf16.gmra.mxu2 %v732_v4  ;;  %v650_v29 = vadd.f32 %v1643_v52, %v649_v23 }
 0x20b   : > { %v962_v31 = vpack.c.bf16 %v936_v30, %v935_v47  ;;  %v684_v32 = vmax.f32 %v650_v29, 0.0 }
 0x20c   : > { %v843_v62 = vpop.f32.mrf.mxu2 }
 0x20d   : > { %1074 = vmatmul.bf16.gmra.mxu3 %v962_v31  ;;  %v844_v42 = vadd.f32 %v1821_v44, %v843_v62  ;;  %v1910_v56 = vadd.f32 %v684_v32, %v1773_v63 }
 0x20f   : > { %v905_v24 = vmax.f32 %v844_v42, 0.0 }
 0x210   : > { %v651_v1 = vpop.f32.mrf.mxu1 }
 0x211   : > { %v652_v38 = vadd.f32 %v1643_v52, %v651_v1  ;;  %v937_v45 = vadd.f32 %v905_v24, %v1767_v59 }
 0x213   : > { %v685_v16 = vmax.f32 %v652_v38, 0.0 }
 0x214   : > { %v845_v55 = vpop.f32.mrf.mxu2 }
 0x215   : > { %v1913_v25 = vadd.f32 %v685_v16, %v1776_v0  ;;  %v846_v57 = vadd.f32 %v1821_v44, %v845_v55 }
 0x217   : > { %v906_v41 = vmax.f32 %v846_v57, 0.0  ;;  %v733_v58 = vpack.c.bf16 %v1913_v25, %v1910_v56 }
 0x219   : > { %v938_v19 = vadd.f32 %v906_v41, %v1770_v60  ;;  %887 = vmatmul.bf16.gmra.mxu2 %v733_v58 }
 0x21b   : > { %v963_v52 = vpack.c.bf16 %v938_v19, %v937_v45 }
 0x21c   : > { %v848_v46 = vpop.f32.mrf.mxu2 }
 0x21d   : > { %1079 = vmatmul.bf16.gmra.mxu3 %v963_v52  ;;  %v849_v63 = vadd.f32 %v1821_v44, %v848_v46 }
 0x21f   : > { %v907_v51 = vmax.f32 %v849_v63, 0.0 }
 0x221   : > { %v939_v54 = vadd.f32 %v907_v51, %v1797_v8  ;;  %v1931_v8 = vld [vmem:[%s2073_s6] ss:$0 sm:$0xff] }
 0x224   : > { %v850_v20 = vpop.f32.mrf.mxu2 }
 0x225   : > { %v851_v0 = vadd.f32 %v1821_v44, %v850_v20 }
 0x227   : > { %v908_v53 = vmax.f32 %v851_v0, 0.0 }
 0x229   : > { %v940_v61 = vadd.f32 %v908_v53, %v1800_v22 }
 0x22b   : > { %v964_v14 = vpack.c.bf16 %v940_v61, %v939_v54 }
 0x22c   : > { %v853_v59 = vpop.f32.mrf.mxu2 }
 0x22d   : > { %1084 = vmatmul.bf16.gmra.mxu3 %v964_v14  ;;  %v854_v60 = vadd.f32 %v1821_v44, %v853_v59 }
 0x22f   : > { %v909_v6 = vmax.f32 %v854_v60, 0.0 }
 0x231   : > { %v941_v11 = vadd.f32 %v909_v6, %v1810_v43 }
 0x234   : > { %v855_v17 = vpop.f32.mrf.mxu2 }
 0x235   : > { %v856_v37 = vadd.f32 %v1821_v44, %v855_v17 }
 0x237   : > { %v910_v9 = vmax.f32 %v856_v37, 0.0 }
 0x239   : > { %v942_v10 = vadd.f32 %v910_v9, %v1813_v15 }
 0x23b   : > { %v965_v12 = vpack.c.bf16 %v942_v10, %v941_v11 }
 0x23c   : > { %v858_v13 = vpop.f32.mrf.mxu2 }
 0x23d   : > { %1089 = vmatmul.bf16.gmra.mxu3 %v965_v12  ;;  %v859_v43 = vadd.f32 %v1821_v44, %v858_v13 }
 0x23f   : > { %v911_v21 = vmax.f32 %v859_v43, 0.0 }
 0x240   : > { %v1050_v22 = vpop.f32.mrf.mxu3 }
 0x241   : > { %v1051_v15 = vadd.f32 %v1931_v8, %v1050_v22  ;;  %v943_v7 = vadd.f32 %v911_v21, %v1826_v2 }
 0x243   : > { %1131 = vst.msk [vmem:[%s1938_s8] sm:$0xff] %vm1130_vm1, %v1051_v15 }
 0x244   : > { %v860_v18 = vpop.f32.mrf.mxu2 }
 0x245   : > { %v861_v33 = vadd.f32 %v1821_v44, %v860_v18 }
 0x247   : > { %v912_v39 = vmax.f32 %v861_v33, 0.0 }
 0x248   : > { %v1052_v34 = vpop.f32.mrf.mxu3 }
 0x249   : > { %v944_v4 = vadd.f32 %v912_v39, %v1829_v27  ;;  %v1053_v23 = vadd.f32 %v1931_v8, %v1052_v34 }
 0x24b   : > { %1132 = vst.msk [vmem:[%s1938_s8 + $0x8] sm:$0xff] %vm1130_vm1, %v1053_v23  ;;  %v966_v47 = vpack.c.bf16 %v944_v4, %v943_v7 }
 0x24c   : > { %v863_v30 = vpop.f32.mrf.mxu2 }
 0x24d   : > { %1094 = vmatmul.bf16.gmra.mxu3 %v966_v47  ;;  %v864_v62 = vadd.f32 %v1821_v44, %v863_v30 }
 0x24f   : > { %v913_v2 = vmax.f32 %v864_v62, 0.0 }
 0x250   : > { %v1055_v31 = vpop.f32.mrf.mxu3 }
 0x251   : > { %v1056_v29 = vadd.f32 %v1931_v8, %v1055_v31  ;;  %v945_v38 = vadd.f32 %v913_v2, %v1840_v35 }
 0x253   : > { %1133 = vst.msk [vmem:[%s1938_s8 + $0x10] sm:$0xff] %vm1130_vm1, %v1056_v29 }
 0x254   : > { %v865_v1 = vpop.f32.mrf.mxu2 }
 0x255   : > { %v866_v27 = vadd.f32 %v1821_v44, %v865_v1 }
 0x257   : > { %v914_v32 = vmax.f32 %v866_v27, 0.0 }
 0x258   : > { %v1057_v42 = vpop.f32.mrf.mxu3 }
 0x259   : > { %v946_v16 = vadd.f32 %v914_v32, %v1843_v36  ;;  %v1058_v55 = vadd.f32 %v1931_v8, %v1057_v42 }
 0x25b   : > { %1134 = vst.msk [vmem:[%s1938_s8 + $0x18] sm:$0xff] %vm1130_vm1, %v1058_v55  ;;  %v967_v24 = vpack.c.bf16 %v946_v16, %v945_v38 }
 0x25c   : > { %v868_v57 = vpop.f32.mrf.mxu2 }
 0x25d   : > { %1099 = vmatmul.bf16.gmra.mxu3 %v967_v24  ;;  %v869_v58 = vadd.f32 %v1821_v44, %v868_v57 }
 0x25f   : > { %v915_v35 = vmax.f32 %v869_v58, 0.0 }
 0x260   : > { %v1060_v41 = vpop.f32.mrf.mxu3 }
 0x261   : > { %v1061_v45 = vadd.f32 %v1931_v8, %v1060_v41  ;;  %v947_v63 = vadd.f32 %v915_v35, %v1854_v5 }
 0x263   : > { %1135 = vst.msk [vmem:[%s1938_s8 + $0x20] sm:$0xff] %vm1130_vm1, %v1061_v45 }
 0x264   : > { %v870_v19 = vpop.f32.mrf.mxu2 }
 0x265   : > { %v871_v36 = vadd.f32 %v1821_v44, %v870_v19 }
 0x267   : > { %v916_v52 = vmax.f32 %v871_v36, 0.0 }
 0x268   : > { %v1062_v46 = vpop.f32.mrf.mxu3 }
 0x269   : > { %v948_v20 = vadd.f32 %v916_v52, %v1857_v28  ;;  %v1063_v51 = vadd.f32 %v1931_v8, %v1062_v46 }
 0x26b   : > { %1136 = vst.msk [vmem:[%s1938_s8 + $0x28] sm:$0xff] %vm1130_vm1, %v1063_v51  ;;  %v968_v0 = vpack.c.bf16 %v948_v20, %v947_v63 }
 0x26c   : > { %v873_v53 = vpop.f32.mrf.mxu2 }
 0x26d   : > { %1104 = vmatmul.bf16.gmra.mxu3 %v968_v0  ;;  %v874_v61 = vadd.f32 %v1821_v44, %v873_v53 }
 0x26f   : > { %v917_v5 = vmax.f32 %v874_v61, 0.0 }
 0x270   : > { %v1065_v54 = vpop.f32.mrf.mxu3 }
 0x271   : > { %v1066_v14 = vadd.f32 %v1931_v8, %v1065_v54  ;;  %v949_v6 = vadd.f32 %v917_v5, %v1868_v48 }
 0x273   : > { %1137 = vst.msk [vmem:[%s1938_s8 + $0x30] sm:$0xff] %vm1130_vm1, %v1066_v14 }
 0x274   : > { %v875_v59 = vpop.f32.mrf.mxu2 }
 0x275   : > { %v876_v28 = vadd.f32 %v1821_v44, %v875_v59 }
 0x277   : > { %v918_v60 = vmax.f32 %v876_v28, 0.0 }
 0x278   : > { %v1067_v17 = vpop.f32.mrf.mxu3 }
 0x279   : > { %v950_v37 = vadd.f32 %v918_v60, %v1871_v26  ;;  %v1068_v9 = vadd.f32 %v1931_v8, %v1067_v17 }
 0x27b   : > { %1138 = vst.msk [vmem:[%s1938_s8 + $0x38] sm:$0xff] %vm1130_vm1, %v1068_v9  ;;  %v969_v11 = vpack.c.bf16 %v950_v37, %v949_v6 }
 0x27c   : > { %v878_v10 = vpop.f32.mrf.mxu2 }
 0x27d   : > { %1109 = vmatmul.bf16.gmra.mxu3 %v969_v11  ;;  %v879_v13 = vadd.f32 %v1821_v44, %v878_v10 }
 0x27f   : > { %v919_v48 = vmax.f32 %v879_v13, 0.0 }
 0x280   : > { %v1070_v12 = vpop.f32.mrf.mxu3 }
 0x281   : > { %v1071_v22 = vadd.f32 %v1931_v8, %v1070_v12  ;;  %v951_v21 = vadd.f32 %v919_v48, %v1882_v49 }
 0x283   : > { %1139 = vst.msk [vmem:[%s1938_s8 + $0x40] sm:$0xff] %vm1130_vm1, %v1071_v22 }
 0x284   : > { %v880_v43 = vpop.f32.mrf.mxu2 }
 0x285   : > { %v881_v26 = vadd.f32 %v1821_v44, %v880_v43 }
 0x287   : > { %v920_v15 = vmax.f32 %v881_v26, 0.0 }
 0x288   : > { %v1072_v18 = vpop.f32.mrf.mxu3 }
 0x289   : > { %v952_v33 = vadd.f32 %v920_v15, %v1885_v50  ;;  %v1073_v39 = vadd.f32 %v1931_v8, %v1072_v18 }
 0x28b   : > { %1140 = vst.msk [vmem:[%s1938_s8 + $0x48] sm:$0xff] %vm1130_vm1, %v1073_v39  ;;  %v970_v34 = vpack.c.bf16 %v952_v33, %v951_v21 }
 0x28c   : > { %v883_v7 = vpop.f32.mrf.mxu2 }
 0x28d   : > { %1114 = vmatmul.bf16.gmra.mxu3 %v970_v34  ;;  %v884_v23 = vadd.f32 %v1821_v44, %v883_v7 }
 0x28f   : > { %v921_v49 = vmax.f32 %v884_v23, 0.0 }
 0x290   : > { %v1075_v4 = vpop.f32.mrf.mxu3 }
 0x291   : > { %v1076_v47 = vadd.f32 %v1931_v8, %v1075_v4  ;;  %v953_v29 = vadd.f32 %v921_v49, %v1896_v3 }
 0x293   : > { %1141 = vst.msk [vmem:[%s1938_s8 + $0x50] sm:$0xff] %vm1130_vm1, %v1076_v47 }
 0x294   : > { %v885_v30 = vpop.f32.mrf.mxu2 }
 0x295   : > { %v886_v50 = vadd.f32 %v1821_v44, %v885_v30 }
 0x297   : > { %v922_v31 = vmax.f32 %v886_v50, 0.0 }
 0x298   : > { %v1077_v62 = vpop.f32.mrf.mxu3 }
 0x299   : > { %v954_v1 = vadd.f32 %v922_v31, %v1899_v40  ;;  %v1078_v2 = vadd.f32 %v1931_v8, %v1077_v62 }
 0x29b   : > { %1142 = vst.msk [vmem:[%s1938_s8 + $0x58] sm:$0xff] %vm1130_vm1, %v1078_v2  ;;  %v971_v27 = vpack.c.bf16 %v954_v1, %v953_v29 }
 0x29c   : > { %v888_v32 = vpop.f32.mrf.mxu2 }
 0x29d   : > { %1119 = vmatmul.bf16.gmra.mxu3 %v971_v27  ;;  %v889_v38 = vadd.f32 %v1821_v44, %v888_v32 }
 0x29f   : > { %v923_v3 = vmax.f32 %v889_v38, 0.0 }
 0x2a0   : > { %v1080_v42 = vpop.f32.mrf.mxu3 }
 0x2a1   : > { %v1081_v16 = vadd.f32 %v1931_v8, %v1080_v42  ;;  %v955_v41 = vadd.f32 %v923_v3, %v1910_v56 }
 0x2a3   : > { %1143 = vst.msk [vmem:[%s1938_s8 + $0x60] sm:$0xff] %vm1130_vm1, %v1081_v16 }
 0x2a4   : > { %v890_v55 = vpop.f32.mrf.mxu2 }
 0x2a5   : > { %v891_v40 = vadd.f32 %v1821_v44, %v890_v55 }
 0x2a7   : > { %v924_v24 = vmax.f32 %v891_v40, 0.0 }
 0x2a8   : > { %v1082_v57 = vpop.f32.mrf.mxu3 }
 0x2a9   : > { %v956_v58 = vadd.f32 %v924_v24, %v1913_v25  ;;  %v1083_v45 = vadd.f32 %v1931_v8, %v1082_v57 }
 0x2ab   : > { %1144 = vst.msk [vmem:[%s1938_s8 + $0x68] sm:$0xff] %vm1130_vm1, %v1083_v45  ;;  %v972_v19 = vpack.c.bf16 %v956_v58, %v955_v41 }
 0x2ad   : > { %1124 = vmatmul.bf16.gmra.mxu3 %v972_v19 }
 0x2b0   : > { %v1085_v35 = vpop.f32.mrf.mxu3 }
 0x2b1   : > { %v1086_v36 = vadd.f32 %v1931_v8, %v1085_v35 }
 0x2b3   : > { %1145 = vst.msk [vmem:[%s1938_s8 + $0x70] sm:$0xff] %vm1130_vm1, %v1086_v36 }
 0x2b8   : > { %v1087_v44 = vpop.f32.mrf.mxu3 }
 0x2b9   : > { %v1088_v52 = vadd.f32 %v1931_v8, %v1087_v44 }
 0x2bb   : > { %1146 = vst.msk [vmem:[%s1938_s8 + $0x78] sm:$0xff] %vm1130_vm1, %v1088_v52 }
 0x2c0   : > { %v1090_v56 = vpop.f32.mrf.mxu3 }
 0x2c1   : > { %v1091_v25 = vadd.f32 %v1931_v8, %v1090_v56 }
 0x2c3   : > { %1147 = vst.msk [vmem:[%s1938_s8 + $0x80] sm:$0xff] %vm1130_vm1, %v1091_v25 }
 0x2c8   : > { %v1092_v46 = vpop.f32.mrf.mxu3 }
 0x2c9   : > { %v1093_v63 = vadd.f32 %v1931_v8, %v1092_v46 }
 0x2cb   : > { %1148 = vst.msk [vmem:[%s1938_s8 + $0x88] sm:$0xff] %vm1130_vm1, %v1093_v63 }
 0x2d0   : > { %v1095_v20 = vpop.f32.mrf.mxu3 }
 0x2d1   : > { %v1096_v51 = vadd.f32 %v1931_v8, %v1095_v20 }
 0x2d3   : > { %1149 = vst.msk [vmem:[%s1938_s8 + $0x90] sm:$0xff] %vm1130_vm1, %v1096_v51 }
 0x2d8   : > { %v1097_v0 = vpop.f32.mrf.mxu3 }
 0x2d9   : > { %v1098_v53 = vadd.f32 %v1931_v8, %v1097_v0 }
 0x2db   : > { %1150 = vst.msk [vmem:[%s1938_s8 + $0x98] sm:$0xff] %vm1130_vm1, %v1098_v53 }
 0x2e0   : > { %v1100_v54 = vpop.f32.mrf.mxu3 }
 0x2e1   : > { %v1101_v61 = vadd.f32 %v1931_v8, %v1100_v54 }
 0x2e3   : > { %1151 = vst.msk [vmem:[%s1938_s8 + $0xa0] sm:$0xff] %vm1130_vm1, %v1101_v61 }
 0x2e8   : > { %v1102_v14 = vpop.f32.mrf.mxu3 }
 0x2e9   : > { %v1103_v59 = vadd.f32 %v1931_v8, %v1102_v14 }
 0x2eb   : > { %1152 = vst.msk [vmem:[%s1938_s8 + $0xa8] sm:$0xff] %vm1130_vm1, %v1103_v59 }
 0x2f0   : > { %v1105_v5 = vpop.f32.mrf.mxu3 }
 0x2f1   : > { %v1106_v28 = vadd.f32 %v1931_v8, %v1105_v5 }
 0x2f3   : > { %1153 = vst.msk [vmem:[%s1938_s8 + $0xb0] sm:$0xff] %vm1130_vm1, %v1106_v28 }
 0x2f8   : > { %v1107_v60 = vpop.f32.mrf.mxu3 }
 0x2f9   : > { %v1108_v17 = vadd.f32 %v1931_v8, %v1107_v60 }
 0x2fb   : > { %1154 = vst.msk [vmem:[%s1938_s8 + $0xb8] sm:$0xff] %vm1130_vm1, %v1108_v17 }
 0x300   : > { %v1110_v6 = vpop.f32.mrf.mxu3 }
 0x301   : > { %v1111_v37 = vadd.f32 %v1931_v8, %v1110_v6 }
 0x303   : > { %1155 = vst.msk [vmem:[%s1938_s8 + $0xc0] sm:$0xff] %vm1130_vm1, %v1111_v37 }
 0x308   : > { %v1112_v9 = vpop.f32.mrf.mxu3 }
 0x309   : > { %v1113_v11 = vadd.f32 %v1931_v8, %v1112_v9 }
 0x30b   : > { %1156 = vst.msk [vmem:[%s1938_s8 + $0xc8] sm:$0xff] %vm1130_vm1, %v1113_v11 }
 0x310   : > { %v1115_v10 = vpop.f32.mrf.mxu3 }
 0x311   : > { %v1116_v12 = vadd.f32 %v1931_v8, %v1115_v10 }
 0x313   : > { %1157 = vst.msk [vmem:[%s1938_s8 + $0xd0] sm:$0xff] %vm1130_vm1, %v1116_v12 }
 0x318   : > { %v1117_v13 = vpop.f32.mrf.mxu3 }
 0x319   : > { %v1118_v22 = vadd.f32 %v1931_v8, %v1117_v13 }
 0x31b   : > { %1158 = vst.msk [vmem:[%s1938_s8 + $0xd8] sm:$0xff] %vm1130_vm1, %v1118_v22 }
 0x320   : > { %v1120_v43 = vpop.f32.mrf.mxu3 }
 0x321   : > { %v1121_v48 = vadd.f32 %v1931_v8, %v1120_v43 }
 0x323   : > { %1159 = vst.msk [vmem:[%s1938_s8 + $0xe0] sm:$0xff] %vm1130_vm1, %v1121_v48 }
 0x328   : > { %v1122_v26 = vpop.f32.mrf.mxu3 }
 0x329   : > { %v1123_v15 = vadd.f32 %v1931_v8, %v1122_v26 }
 0x32b   : > { %1160 = vst.msk [vmem:[%s1938_s8 + $0xe8] sm:$0xff] %vm1130_vm1, %v1123_v15 }
 0x330   : > { %v1125_v18 = vpop.f32.mrf.mxu3 }
 0x331   : > { %v1126_v21 = vadd.f32 %v1931_v8, %v1125_v18 }
 0x333   : > { %1161 = vst.msk [vmem:[%s1938_s8 + $0xf0] sm:$0xff] %vm1130_vm1, %v1126_v21 }
 0x338   : > { %v1127_v33 = vpop.f32.mrf.mxu3 }
 0x339   : > { %v1128_v39 = vadd.f32 %v1931_v8, %v1127_v33 }
 0x33b   : > { %1162 = vst.msk [vmem:[%s1938_s8 + $0xf8] sm:$0xff] %vm1130_vm1, %v1128_v39 }
 0x33c PF: > { %s17_s24 = sadd.s32 1, %s1406_s24  }
 0x33d   : > { %p14_p4 = scmp.ge.s32.totalorder %s17_s24, 4  }
 0x33f   :  { %16 = sbr.rel (!%p14_p4) target bundleno = 1 (0x1), region = 80 }

</bundles_post_ra>
